<compile_context>
chip_gen: v6e
topology: v6e:2x2x1
jax: 0.10.0
libtpu: 0.0.40
codegen_flags: <defaults>
</compile_context>

<pallas_src>
import math
from functools import partial

import jax
import jax.numpy as jnp
from jax.experimental import pallas as pl
from jax.experimental.pallas import tpu as pltpu


def _layernorm(v, w, b, eps=1e-5):
    mu = jnp.mean(v, axis=-1, keepdims=True)
    var = jnp.mean(jnp.square(v - mu), axis=-1, keepdims=True)
    return (v - mu) * jax.lax.rsqrt(var + eps) * w + b


# ----------------------- stage 1: LN1 + RWKV_TimeMix + residual -----------------------
def _timemix_kernel(
    # inputs
    x_ref, sA_ref, sB_ref, sp_ref, sx_ref,
    ln1w_ref, ln1b_ref, tmk_ref, tmv_ref, tmr_ref,
    tfirst_ref, negdecay_ref,
    wk_ref, wv_ref, wr_ref, wo_ref,
    # outputs
    x1_ref, nA_ref, nB_ref, np_ref, nx_ref,
    # scratch
    xk_s, xv_s, xr_s, acc_s,
):
    j = pl.program_id(0)
    nj = pl.num_programs(0)

    @pl.when(j == 0)
    def _init():
        x = x_ref[...]
        xn = _layernorm(x, ln1w_ref[...], ln1b_ref[...])
        sx = sx_ref[...]
        tmk = tmk_ref[...]
        tmv = tmv_ref[...]
        tmr = tmr_ref[...]
        nx_ref[...] = xn                       # new_x = ln1(x); resident output block
        xk_s[...] = xn * tmk + sx * (1.0 - tmk)
        xv_s[...] = xn * tmv + sx * (1.0 - tmv)
        xr_s[...] = xn * tmr + sx * (1.0 - tmr)
        acc_s[...] = jnp.zeros_like(acc_s)

    # column tile j of k / v / r  (weights streamed as bf16 (D, td) tiles)
    k = jnp.dot(xk_s[...].astype(wk_ref.dtype), wk_ref[...],
                preferred_element_type=jnp.float32)
    v = jnp.dot(xv_s[...].astype(wv_ref.dtype), wv_ref[...],
                preferred_element_type=jnp.float32)
    r = jax.nn.sigmoid(jnp.dot(xr_s[...].astype(wr_ref.dtype), wr_ref[...],
                               preferred_element_type=jnp.float32))

    sA = sA_ref[...]
    sB = sB_ref[...]
    sp = sp_ref[...]
    tfst = tfirst_ref[...]      # time_first tile (1, td)
    ned = negdecay_ref[...]     # precomputed -exp(time_decay) tile (1, td)

    # per-channel recurrence (f32, max-shifted exponentials) -- column local
    ww = tfst + k
    p = jnp.maximum(sp, ww)
    e1 = jnp.exp(sp - p)
    e2 = jnp.exp(ww - p)
    a = e1 * sA + e2 * v
    b = e1 * sB + e2

    ww2 = sp + ned
    p2 = jnp.maximum(ww2, k)
    e1b = jnp.exp(ww2 - p2)
    e2b = jnp.exp(k - p2)
    nA_ref[...] = e1b * sA + e2b * v
    nB_ref[...] = e1b * sB + e2b
    np_ref[...] = p2

    rwkv = r * a * pl.reciprocal(b, approx=True)
    acc_s[...] += jnp.dot(rwkv.astype(wo_ref.dtype), wo_ref[...],
                          preferred_element_type=jnp.float32)

    @pl.when(j == nj - 1)
    def _fin():
        x1_ref[...] = x_ref[...] + acc_s[...]   # residual 1


# ---------------------- stage 2: LN2 + RWKV_ChannelMix + residual ----------------------
def _channelmix_kernel(
    # inputs
    x1_ref, sffn_ref,
    ln2w_ref, ln2b_ref, ctmk_ref, ctmr_ref,
    cwk_ref, cwr_ref, cwv_ref,
    # outputs
    out_ref, nffn_ref,
    # scratch
    xk2_s, xr2_s, rr_s, kv_s,
):
    h = pl.program_id(0)
    nh = pl.num_programs(0)

    @pl.when(h == 0)
    def _init():
        x1 = x1_ref[...]
        xn2 = _layernorm(x1, ln2w_ref[...], ln2b_ref[...])
        sffn = sffn_ref[...]
        ctmk = ctmk_ref[...]
        ctmr = ctmr_ref[...]
        nffn_ref[...] = xn2                    # new_ffn = ln2(x1); resident output block
        xk2_s[...] = xn2 * ctmk + sffn * (1.0 - ctmk)
        xr2_s[...] = xn2 * ctmr + sffn * (1.0 - ctmr)
        kv_s[...] = jnp.zeros_like(kv_s)

    # hidden-column tile h: squared-ReLU key, then partial value projection (accumulate)
    kk = jnp.dot(xk2_s[...].astype(cwk_ref.dtype), cwk_ref[...],
                 preferred_element_type=jnp.float32)
    kk = jnp.square(jnp.maximum(kk, 0.0))
    kv_s[...] += jnp.dot(kk.astype(cwv_ref.dtype), cwv_ref[...],
                         preferred_element_type=jnp.float32)

    # receptance streamed over the same grid axis; sigmoid applied per tile (EUP)
    tcr = cwr_ref.shape[1]
    col0 = pl.multiple_of(h * tcr, 128)
    rr_s[:, pl.ds(col0, tcr)] = jax.nn.sigmoid(jnp.dot(
        xr2_s[...].astype(cwr_ref.dtype), cwr_ref[...],
        preferred_element_type=jnp.float32))

    @pl.when(h == nh - 1)
    def _fin():
        out_ref[...] = x1_ref[...] + rr_s[...] * kv_s[...]   # residual 2


# -------------------------------------- wrapper --------------------------------------
def _pick_tile(dim, preferred=(512, 256, 128)):
    for t in preferred:
        if dim % t == 0:
            return t
    return dim


def _pick_ffn_tile(D, F, preferred=(512, 256, 128)):
    for t in preferred:
        if F % t != 0:
            continue
        nh = F // t
        if D % nh == 0 and ((D // nh) % 128 == 0 or nh == 1):
            return t
    return F   # fallback: single step, receptance handled in one shot


def prepare_params(params, weight_dtype=jnp.bfloat16):
    """One-time prep (call at model init, NOT per token): cast the large linear
    weights to bf16 and hoist -exp(time_decay).  Avoids re-casting ~all weights
    from HBM on every inference step of this memory-bound block."""
    p = dict(params)
    for name in ("att_wk", "att_wv", "att_wr", "att_wo",
                 "ffn_wk", "ffn_wr", "ffn_wv"):
        p[name] = params[name].astype(weight_dtype)
    p["negdecay"] = (-jnp.exp(params["time_decay"])).astype(jnp.float32)
    return p


def block_script(x, state_A, state_B, state_p, state_x, state_ffn, params,
                 td=None, tf=None, weight_dtype=jnp.bfloat16):
    if "negdecay" not in params:               # allow raw params; prefer prepare_params()
        params = prepare_params(params, weight_dtype)

    B, D = x.shape
    F = params["ffn_wk"].shape[1]

    td = _pick_tile(D) if td is None else td
    tf = _pick_ffn_tile(D, F) if tf is None else tf
    assert D % td == 0 and (td % 128 == 0 or td == D)
    assert F % tf == 0 and (tf % 128 == 0 or tf == F)
    n_j = D // td
    n_h = F // tf
    assert D % n_h == 0
    tcr = D // n_h
    assert tcr % 128 == 0 or n_h == 1

    f32 = jnp.float32
    wk, wv, wr, wo = params["att_wk"], params["att_wv"], params["att_wr"], params["att_wo"]
    cwk, cwr, cwv = params["ffn_wk"], params["ffn_wr"], params["ffn_wv"]
    negdecay = params["negdecay"]
    wd_bytes = jnp.dtype(wk.dtype).itemsize

    cp = pltpu.CompilerParams(
        dimension_semantics=("arbitrary",),      # accumulator axis -> must be sequential
        vmem_limit_bytes=64 * 1024 * 1024,
    )

    # ---------------- stage 1 ----------------
    full_bd = pl.BlockSpec((B, D), lambda j: (0, 0))
    full_1d = pl.BlockSpec((1, D), lambda j: (0, 0))
    col_bd = pl.BlockSpec((B, td), lambda j: (0, j))
    col_1d = pl.BlockSpec((1, td), lambda j: (0, j))

    gs1 = pltpu.PrefetchScalarGridSpec(
        num_scalar_prefetch=0, grid=(n_j,),
        in_specs=[
            full_bd, col_bd, col_bd, col_bd, full_bd,      # x, state_A, state_B, state_p, state_x
            full_1d, full_1d, full_1d, full_1d, full_1d,   # ln1_w, ln1_b, mix_k, mix_v, mix_r
            col_1d, col_1d,                                # time_first, -exp(time_decay)
            pl.BlockSpec((D, td), lambda j: (0, j)),       # wk (stream cols)
            pl.BlockSpec((D, td), lambda j: (0, j)),       # wv
            pl.BlockSpec((D, td), lambda j: (0, j)),       # wr
            pl.BlockSpec((td, D), lambda j: (j, 0)),       # wo (stream rows, accumulate)
        ],
        out_specs=[full_bd, col_bd, col_bd, col_bd, full_bd],  # x1, new_A, new_B, new_p, new_x
        scratch_shapes=[pltpu.VMEM((B, D), f32)] * 4,
    )
    ce1 = pl.CostEstimate(
        flops=8 * B * D * D,
        transcendentals=8 * B * D,
        bytes_accessed=4 * D * D * wd_bytes + 12 * B * D * 4,
    )
    x1, new_A, new_B, new_p, new_x = pl.pallas_call(
        _timemix_kernel,
        out_shape=tuple(jax.ShapeDtypeStruct((B, D), f32) for _ in range(5)),
        grid_spec=gs1,
        compiler_params=cp,
        cost_estimate=ce1,
        input_output_aliases={1: 1, 2: 2, 3: 3, 4: 4},   # states alias their updates
    )(x, state_A, state_B, state_p, state_x,
      params["ln1_w"], params["ln1_b"],
      params["att_mix_k"], params["att_mix_v"], params["att_mix_r"],
      params["time_first"], negdecay,
      wk, wv, wr, wo)

    # ---------------- stage 2 ----------------
    full_bd2 = pl.BlockSpec((B, D), lambda h: (0, 0))
    full_1d2 = pl.BlockSpec((1, D), lambda h: (0, 0))
    gs2 = pltpu.PrefetchScalarGridSpec(
        num_scalar_prefetch=0, grid=(n_h,),
        in_specs=[
            full_bd2, full_bd2,                            # x1, state_ffn
            full_1d2, full_1d2, full_1d2, full_1d2,        # ln2_w, ln2_b, ffn_mix_k, ffn_mix_r
            pl.BlockSpec((D, tf), lambda h: (0, h)),       # ffn_wk (stream cols)
            pl.BlockSpec((D, tcr), lambda h: (0, h)),      # ffn_wr (stream cols, same axis)
            pl.BlockSpec((tf, D), lambda h: (h, 0)),       # ffn_wv (stream rows, accumulate)
        ],
        out_specs=[full_bd2, full_bd2],                    # out, new_ffn
        scratch_shapes=[pltpu.VMEM((B, D), f32)] * 4,
    )
    ce2 = pl.CostEstimate(
        flops=2 * B * (D * D + 2 * D * F),
        transcendentals=B * D,
        bytes_accessed=(D * D + 2 * D * F) * wd_bytes + 8 * B * D * 4,
    )
    out, new_ffn = pl.pallas_call(
        _channelmix_kernel,
        out_shape=tuple(jax.ShapeDtypeStruct((B, D), f32) for _ in range(2)),
        grid_spec=gs2,
        compiler_params=cp,
        cost_estimate=ce2,
        input_output_aliases={1: 1},                       # state_ffn -> new_ffn
    )(x1, state_ffn,
      params["ln2_w"], params["ln2_b"],
      params["ffn_mix_k"], params["ffn_mix_r"],
      cwk, cwr, cwv)

    return out, new_A, new_B, new_p, new_x, new_ffn


# -------------------------------- pure-JAX reference ---------------------------------
def block_reference(x, sA, sB, sp, sx, sffn, params, weight_dtype=jnp.bfloat16):
    f32 = jnp.float32
    cast = lambda w: w.astype(weight_dtype).astype(f32)   # same rounding as the kernel

    xn = _layernorm(x, params["ln1_w"], params["ln1_b"])
    tmk, tmv, tmr = params["att_mix_k"], params["att_mix_v"], params["att_mix_r"]
    xk = xn * tmk + sx * (1 - tmk)
    xv = xn * tmv + sx * (1 - tmv)
    xr = xn * tmr + sx * (1 - tmr)
    new_x = xn
    k = xk @ cast(params["att_wk"])
    v = xv @ cast(params["att_wv"])
    r = jax.nn.sigmoid(xr @ cast(params["att_wr"]))
    ww = params["time_first"] + k
    p = jnp.maximum(sp, ww)
    e1 = jnp.exp(sp - p)
    e2 = jnp.exp(ww - p)
    a = e1 * sA + e2 * v
    b = e1 * sB + e2
    ww2 = sp + (-jnp.exp(params["time_decay"]))
    p2 = jnp.maximum(ww2, k)
    e1b = jnp.exp(ww2 - p2)
    e2b = jnp.exp(k - p2)
    new_A = e1b * sA + e2b * v
    new_B = e1b * sB + e2b
    new_p = p2
    att = (r * a / b) @ cast(params["att_wo"])
    x1 = x + att

    xn2 = _layernorm(x1, params["ln2_w"], params["ln2_b"])
    ctmk, ctmr = params["ffn_mix_k"], params["ffn_mix_r"]
    xk2 = xn2 * ctmk + sffn * (1 - ctmk)
    xr2 = xn2 * ctmr + sffn * (1 - ctmr)
    new_ffn = xn2
    rr = jax.nn.sigmoid(xr2 @ cast(params["ffn_wr"]))
    kk = jnp.square(jnp.maximum(xk2 @ cast(params["ffn_wk"]), 0.0))
    kv = kk @ cast(params["ffn_wv"])
    out = x1 + rr * kv
    return out, new_A, new_B, new_p, new_x, new_ffn


def init_params(key, n_embed, ffn_dim):
    ks = jax.random.split(key, 12)
    f32 = jnp.float32
    return {
        "ln1_w": jnp.ones((1, n_embed), f32),
        "ln1_b": jnp.zeros((1, n_embed), f32),
        "ln2_w": jnp.ones((1, n_embed), f32),
        "ln2_b": jnp.zeros((1, n_embed), f32),
        "time_decay": 0.1 * jax.random.normal(ks[0], (1, n_embed), f32),
        "time_first": jnp.full((1, n_embed), math.log(0.3), f32),
        "att_mix_k": jax.random.uniform(ks[1], (1, n_embed), f32),
        "att_mix_v": jax.random.uniform(ks[2], (1, n_embed), f32),
        "att_mix_r": jax.random.uniform(ks[3], (1, n_embed), f32),
        # linear weights stored as (in_dim, out_dim) = nn.Linear.weight.T
        "att_wk": 0.1 * jax.random.normal(ks[4], (n_embed, n_embed), f32),
        "att_wv": 0.1 * jax.random.normal(ks[5], (n_embed, n_embed), f32),
        "att_wr": 0.1 * jax.random.normal(ks[6], (n_embed, n_embed), f32),
        "att_wo": 0.1 * jax.random.normal(ks[7], (n_embed, n_embed), f32),
        "ffn_mix_k": jax.random.uniform(ks[8], (1, n_embed), f32),
        "ffn_mix_r": jax.random.uniform(ks[9], (1, n_embed), f32),
        "ffn_wk": 0.1 * jax.random.normal(ks[10], (n_embed, ffn_dim), f32),
        "ffn_wr": 0.1 * jax.random.normal(ks[11], (n_embed, n_embed), f32),
        "ffn_wv": 0.05 * jax.random.normal(ks[0], (ffn_dim, n_embed), f32),
    }


if __name__ == "__main__":
    # lane/sublane-friendly small test shapes: batch multiple of 8, dims multiples of 128
    B, D, F = 8, 256, 512
    key = jax.random.PRNGKey(0)
    kx, ka, kb, kp, ksx, kf, kparam = jax.random.split(key, 7)

    x = jax.random.normal(kx, (B, D), jnp.float32)
    state_A = 0.1 * jax.random.normal(ka, (B, D), jnp.float32)
    state_B = 1.0 + 0.1 * jax.random.normal(kb, (B, D), jnp.float32)
    state_p = -1.0 + 0.1 * jax.random.normal(kp, (B, D), jnp.float32)
    state_x = 0.1 * jax.random.normal(ksx, (B, D), jnp.float32)
    state_ffn = 0.1 * jax.random.normal(kf, (B, D), jnp.float32)
    params = init_params(kparam, D, F)

    # reference first (computed before the aliased pallas_call consumes anything)
    refs = jax.block_until_ready(
        block_reference(x, state_A, state_B, state_p, state_x, state_ffn, params))

    # one-time prep (bf16 weight cast + hoisted -exp(time_decay)), outside the jitted step
    prepared = jax.block_until_ready(prepare_params(params))

    run = jax.jit(partial(block_script, td=128, tf=256))   # grids: n_j=2, n_h=2 (tcr=128)
    outs = jax.block_until_ready(
        run(x, state_A, state_B, state_p, state_x, state_ffn, prepared))

    assert len(outs) == 6
    for o, r in zip(outs, refs):
        assert o.shape == (B, D)
        assert bool(jnp.all(jnp.isfinite(o)))
        tol = 1e-1 + 5e-2 * float(jnp.max(jnp.abs(r)))     # loose: bf16 weights + approx recip
        assert float(jnp.max(jnp.abs(o - r))) < tol, float(jnp.max(jnp.abs(o - r)))

    print("KERNEL_OK")
</pallas_src>

<mosaic_0001>
module attributes {stable_mosaic.version = 11 : i64} {
  func.func @_timemix_kernel(%arg0: i32, %arg1: memref<8x256xf32, #tpu.memory_space<vmem>>, %arg2: memref<8x128xf32, #tpu.memory_space<vmem>>, %arg3: memref<8x128xf32, #tpu.memory_space<vmem>>, %arg4: memref<8x128xf32, #tpu.memory_space<vmem>>, %arg5: memref<8x256xf32, #tpu.memory_space<vmem>>, %arg6: memref<1x256xf32, #tpu.memory_space<vmem>>, %arg7: memref<1x256xf32, #tpu.memory_space<vmem>>, %arg8: memref<1x256xf32, #tpu.memory_space<vmem>>, %arg9: memref<1x256xf32, #tpu.memory_space<vmem>>, %arg10: memref<1x256xf32, #tpu.memory_space<vmem>>, %arg11: memref<1x128xf32, #tpu.memory_space<vmem>>, %arg12: memref<1x128xf32, #tpu.memory_space<vmem>>, %arg13: memref<256x128xbf16, #tpu.memory_space<vmem>>, %arg14: memref<256x128xbf16, #tpu.memory_space<vmem>>, %arg15: memref<256x128xbf16, #tpu.memory_space<vmem>>, %arg16: memref<128x256xbf16, #tpu.memory_space<vmem>>, %arg17: memref<8x256xf32, #tpu.memory_space<vmem>>, %arg18: memref<8x128xf32, #tpu.memory_space<vmem>>, %arg19: memref<8x128xf32, #tpu.memory_space<vmem>>, %arg20: memref<8x128xf32, #tpu.memory_space<vmem>>, %arg21: memref<8x256xf32, #tpu.memory_space<vmem>>, %arg22: memref<8x256xf32, #tpu.memory_space<vmem>>, %arg23: memref<8x256xf32, #tpu.memory_space<vmem>>, %arg24: memref<8x256xf32, #tpu.memory_space<vmem>>, %arg25: memref<8x256xf32, #tpu.memory_space<vmem>>) attributes {dimension_semantics = [#tpu.dimension_semantics<arbitrary>], iteration_bounds = array<i64: 2>, scalar_prefetch = 0 : i64, scratch_operands = 4 : i64, tpu.core_type = #tpu.core_type<tc>, window_params = [{pipeline_mode = #tpu.pipeline_mode<synchronous>, transform_indices = @transform_0, window_bounds = array<i64: 8, 256>}, {transform_indices = @transform_1, window_bounds = array<i64: 8, 128>}, {transform_indices = @transform_2, window_bounds = array<i64: 8, 128>}, {transform_indices = @transform_3, window_bounds = array<i64: 8, 128>}, {pipeline_mode = #tpu.pipeline_mode<synchronous>, transform_indices = @transform_4, window_bounds = array<i64: 8, 256>}, {pipeline_mode = #tpu.pipeline_mode<synchronous>, transform_indices = @transform_5, window_bounds = array<i64: 1, 256>}, {pipeline_mode = #tpu.pipeline_mode<synchronous>, transform_indices = @transform_6, window_bounds = array<i64: 1, 256>}, {pipeline_mode = #tpu.pipeline_mode<synchronous>, transform_indices = @transform_7, window_bounds = array<i64: 1, 256>}, {pipeline_mode = #tpu.pipeline_mode<synchronous>, transform_indices = @transform_8, window_bounds = array<i64: 1, 256>}, {pipeline_mode = #tpu.pipeline_mode<synchronous>, transform_indices = @transform_9, window_bounds = array<i64: 1, 256>}, {transform_indices = @transform_10, window_bounds = array<i64: 1, 128>}, {transform_indices = @transform_11, window_bounds = array<i64: 1, 128>}, {transform_indices = @transform_12, window_bounds = array<i64: 256, 128>}, {transform_indices = @transform_13, window_bounds = array<i64: 256, 128>}, {transform_indices = @transform_14, window_bounds = array<i64: 256, 128>}, {transform_indices = @transform_15, window_bounds = array<i64: 128, 256>}, {pipeline_mode = #tpu.pipeline_mode<synchronous>, transform_indices = @transform_16, window_bounds = array<i64: 8, 256>}, {transform_indices = @transform_17, window_bounds = array<i64: 8, 128>}, {transform_indices = @transform_18, window_bounds = array<i64: 8, 128>}, {transform_indices = @transform_19, window_bounds = array<i64: 8, 128>}, {pipeline_mode = #tpu.pipeline_mode<synchronous>, transform_indices = @transform_20, window_bounds = array<i64: 8, 256>}]} {
    %c0_i32 = arith.constant 0 : i32
    %0 = arith.cmpi eq, %arg0, %c0_i32 : i32
    %1 = arith.extui %0 : i1 to i32
    %c0_i32_0 = arith.constant 0 : i32
    %2 = arith.cmpi ne, %1, %c0_i32_0 : i32
    scf.if %2 {
      %c0_39 = arith.constant 0 : index
      %c0_40 = arith.constant 0 : index
      %64 = vector.load %arg1[%c0_39, %c0_40] : memref<8x256xf32, #tpu.memory_space<vmem>>, vector<8x256xf32>
      %c0_41 = arith.constant 0 : index
      %c0_42 = arith.constant 0 : index
      %65 = vector.load %arg6[%c0_41, %c0_42] : memref<1x256xf32, #tpu.memory_space<vmem>>, vector<1x256xf32>
      %c0_43 = arith.constant 0 : index
      %c0_44 = arith.constant 0 : index
      %66 = vector.load %arg7[%c0_43, %c0_44] : memref<1x256xf32, #tpu.memory_space<vmem>>, vector<1x256xf32>
      %cst_45 = arith.constant dense<0.000000e+00> : vector<8xf32>
      %67 = vector.multi_reduction <add>, %64, %cst_45 [1] : vector<8x256xf32> to vector<8xf32>
      %68 = vector.shape_cast %67 : vector<8xf32> to vector<8x1xf32>
      %cst_46 = arith.constant 2.560000e+02 : f32
      %69 = vector.broadcast %cst_46 : f32 to vector<8x1xf32>
      %70 = arith.divf %68, %69 : vector<8x1xf32>
      %71 = vector.broadcast %70 : vector<8x1xf32> to vector<8x256xf32>
      %72 = arith.subf %64, %71 : vector<8x256xf32>
      %73 = arith.mulf %72, %72 : vector<8x256xf32>
      %cst_47 = arith.constant dense<0.000000e+00> : vector<8xf32>
      %74 = vector.multi_reduction <add>, %73, %cst_47 [1] : vector<8x256xf32> to vector<8xf32>
      %75 = vector.shape_cast %74 : vector<8xf32> to vector<8x1xf32>
      %cst_48 = arith.constant 2.560000e+02 : f32
      %76 = vector.broadcast %cst_48 : f32 to vector<8x1xf32>
      %77 = arith.divf %75, %76 : vector<8x1xf32>
      %78 = vector.broadcast %70 : vector<8x1xf32> to vector<8x256xf32>
      %79 = arith.subf %64, %78 : vector<8x256xf32>
      %cst_49 = arith.constant 9.99999974E-6 : f32
      %80 = vector.broadcast %cst_49 : f32 to vector<8x1xf32>
      %81 = arith.addf %77, %80 : vector<8x1xf32>
      %82 = math.rsqrt %81 : vector<8x1xf32>
      %83 = vector.broadcast %82 : vector<8x1xf32> to vector<8x256xf32>
      %84 = arith.mulf %79, %83 : vector<8x256xf32>
      %85 = vector.broadcast %65 : vector<1x256xf32> to vector<8x256xf32>
      %86 = arith.mulf %84, %85 : vector<8x256xf32>
      %87 = vector.broadcast %66 : vector<1x256xf32> to vector<8x256xf32>
      %88 = arith.addf %86, %87 : vector<8x256xf32>
      %c0_50 = arith.constant 0 : index
      %c0_51 = arith.constant 0 : index
      %89 = vector.load %arg5[%c0_50, %c0_51] : memref<8x256xf32, #tpu.memory_space<vmem>>, vector<8x256xf32>
      %c0_52 = arith.constant 0 : index
      %c0_53 = arith.constant 0 : index
      %90 = vector.load %arg8[%c0_52, %c0_53] : memref<1x256xf32, #tpu.memory_space<vmem>>, vector<1x256xf32>
      %c0_54 = arith.constant 0 : index
      %c0_55 = arith.constant 0 : index
      %91 = vector.load %arg9[%c0_54, %c0_55] : memref<1x256xf32, #tpu.memory_space<vmem>>, vector<1x256xf32>
      %c0_56 = arith.constant 0 : index
      %c0_57 = arith.constant 0 : index
      %92 = vector.load %arg10[%c0_56, %c0_57] : memref<1x256xf32, #tpu.memory_space<vmem>>, vector<1x256xf32>
      %c0_58 = arith.constant 0 : index
      %c0_59 = arith.constant 0 : index
      %93 = vector.load %arg21[%c0_58, %c0_59] : memref<8x256xf32, #tpu.memory_space<vmem>>, vector<8x256xf32>
      tpu.vector_store %arg21[%c0_58, %c0_59], %88 {strides = array<i32>} : memref<8x256xf32, #tpu.memory_space<vmem>>, vector<8x256xf32>,
      %94 = vector.broadcast %90 : vector<1x256xf32> to vector<8x256xf32>
      %95 = arith.mulf %88, %94 : vector<8x256xf32>
      %cst_60 = arith.constant 1.000000e+00 : f32
      %96 = vector.broadcast %cst_60 : f32 to vector<1x256xf32>
      %97 = arith.subf %96, %90 : vector<1x256xf32>
      %98 = vector.broadcast %97 : vector<1x256xf32> to vector<8x256xf32>
      %99 = arith.mulf %89, %98 : vector<8x256xf32>
      %100 = arith.addf %95, %99 : vector<8x256xf32>
      %c0_61 = arith.constant 0 : index
      %c0_62 = arith.constant 0 : index
      %101 = vector.load %arg22[%c0_61, %c0_62] : memref<8x256xf32, #tpu.memory_space<vmem>>, vector<8x256xf32>
      tpu.vector_store %arg22[%c0_61, %c0_62], %100 {strides = array<i32>} : memref<8x256xf32, #tpu.memory_space<vmem>>, vector<8x256xf32>,
      %102 = vector.broadcast %91 : vector<1x256xf32> to vector<8x256xf32>
      %103 = arith.mulf %88, %102 : vector<8x256xf32>
      %cst_63 = arith.constant 1.000000e+00 : f32
      %104 = vector.broadcast %cst_63 : f32 to vector<1x256xf32>
      %105 = arith.subf %104, %91 : vector<1x256xf32>
      %106 = vector.broadcast %105 : vector<1x256xf32> to vector<8x256xf32>
      %107 = arith.mulf %89, %106 : vector<8x256xf32>
      %108 = arith.addf %103, %107 : vector<8x256xf32>
      %c0_64 = arith.constant 0 : index
      %c0_65 = arith.constant 0 : index
      %109 = vector.load %arg23[%c0_64, %c0_65] : memref<8x256xf32, #tpu.memory_space<vmem>>, vector<8x256xf32>
      tpu.vector_store %arg23[%c0_64, %c0_65], %108 {strides = array<i32>} : memref<8x256xf32, #tpu.memory_space<vmem>>, vector<8x256xf32>,
      %110 = vector.broadcast %92 : vector<1x256xf32> to vector<8x256xf32>
      %111 = arith.mulf %88, %110 : vector<8x256xf32>
      %cst_66 = arith.constant 1.000000e+00 : f32
      %112 = vector.broadcast %cst_66 : f32 to vector<1x256xf32>
      %113 = arith.subf %112, %92 : vector<1x256xf32>
      %114 = vector.broadcast %113 : vector<1x256xf32> to vector<8x256xf32>
      %115 = arith.mulf %89, %114 : vector<8x256xf32>
      %116 = arith.addf %111, %115 : vector<8x256xf32>
      %c0_67 = arith.constant 0 : index
      %c0_68 = arith.constant 0 : index
      %117 = vector.load %arg24[%c0_67, %c0_68] : memref<8x256xf32, #tpu.memory_space<vmem>>, vector<8x256xf32>
      tpu.vector_store %arg24[%c0_67, %c0_68], %116 {strides = array<i32>} : memref<8x256xf32, #tpu.memory_space<vmem>>, vector<8x256xf32>,
      %cst_69 = arith.constant 0.000000e+00 : f32
      %118 = vector.broadcast %cst_69 : f32 to vector<8x256xf32>
      %c0_70 = arith.constant 0 : index
      %c0_71 = arith.constant 0 : index
      %119 = vector.load %arg25[%c0_70, %c0_71] : memref<8x256xf32, #tpu.memory_space<vmem>>, vector<8x256xf32>
      tpu.vector_store %arg25[%c0_70, %c0_71], %118 {strides = array<i32>} : memref<8x256xf32, #tpu.memory_space<vmem>>, vector<8x256xf32>,
    } else {
    }
    %c0 = arith.constant 0 : index
    %c0_1 = arith.constant 0 : index
    %3 = vector.load %arg22[%c0, %c0_1] : memref<8x256xf32, #tpu.memory_space<vmem>>, vector<8x256xf32>
    %4 = arith.truncf %3 : vector<8x256xf32> to vector<8x256xbf16>
    %c0_2 = arith.constant 0 : index
    %c0_3 = arith.constant 0 : index
    %5 = vector.load %arg13[%c0_2, %c0_3] : memref<256x128xbf16, #tpu.memory_space<vmem>>, vector<256x128xbf16>
    %cst = arith.constant dense<0.000000e+00> : vector<8x128xf32>
    %6 = tpu.matmul %4, %5, %cst {dimension_numbers = #tpu.dot_dimension_numbers<[1], [0], [0], [1], [0, 0, 1, 1], [], []>} : vector<8x256xbf16>, vector<256x128xbf16>, vector<8x128xf32> -> vector<8x128xf32>
    %c0_4 = arith.constant 0 : index
    %c0_5 = arith.constant 0 : index
    %7 = vector.load %arg23[%c0_4, %c0_5] : memref<8x256xf32, #tpu.memory_space<vmem>>, vector<8x256xf32>
    %8 = arith.truncf %7 : vector<8x256xf32> to vector<8x256xbf16>
    %c0_6 = arith.constant 0 : index
    %c0_7 = arith.constant 0 : index
    %9 = vector.load %arg14[%c0_6, %c0_7] : memref<256x128xbf16, #tpu.memory_space<vmem>>, vector<256x128xbf16>
    %cst_8 = arith.constant dense<0.000000e+00> : vector<8x128xf32>
    %10 = tpu.matmul %8, %9, %cst_8 {dimension_numbers = #tpu.dot_dimension_numbers<[1], [0], [0], [1], [0, 0, 1, 1], [], []>} : vector<8x256xbf16>, vector<256x128xbf16>, vector<8x128xf32> -> vector<8x128xf32>
    %c0_9 = arith.constant 0 : index
    %c0_10 = arith.constant 0 : index
    %11 = vector.load %arg24[%c0_9, %c0_10] : memref<8x256xf32, #tpu.memory_space<vmem>>, vector<8x256xf32>
    %12 = arith.truncf %11 : vector<8x256xf32> to vector<8x256xbf16>
    %c0_11 = arith.constant 0 : index
    %c0_12 = arith.constant 0 : index
    %13 = vector.load %arg15[%c0_11, %c0_12] : memref<256x128xbf16, #tpu.memory_space<vmem>>, vector<256x128xbf16>
    %cst_13 = arith.constant dense<0.000000e+00> : vector<8x128xf32>
    %14 = tpu.matmul %12, %13, %cst_13 {dimension_numbers = #tpu.dot_dimension_numbers<[1], [0], [0], [1], [0, 0, 1, 1], [], []>} : vector<8x256xbf16>, vector<256x128xbf16>, vector<8x128xf32> -> vector<8x128xf32>
    %15 = arith.negf %14 : vector<8x128xf32>
    %16 = math.exp %15 : vector<8x128xf32>
    %cst_14 = arith.constant 1.000000e+00 : f32
    %17 = vector.broadcast %cst_14 : f32 to vector<8x128xf32>
    %18 = arith.addf %17, %16 : vector<8x128xf32>
    %19 = arith.divf %17, %18 : vector<8x128xf32>
    %c0_15 = arith.constant 0 : index
    %c0_16 = arith.constant 0 : index
    %20 = vector.load %arg2[%c0_15, %c0_16] : memref<8x128xf32, #tpu.memory_space<vmem>>, vector<8x128xf32>
    %c0_17 = arith.constant 0 : index
    %c0_18 = arith.constant 0 : index
    %21 = vector.load %arg3[%c0_17, %c0_18] : memref<8x128xf32, #tpu.memory_space<vmem>>, vector<8x128xf32>
    %c0_19 = arith.constant 0 : index
    %c0_20 = arith.constant 0 : index
    %22 = vector.load %arg4[%c0_19, %c0_20] : memref<8x128xf32, #tpu.memory_space<vmem>>, vector<8x128xf32>
    %c0_21 = arith.constant 0 : index
    %c0_22 = arith.constant 0 : index
    %23 = vector.load %arg11[%c0_21, %c0_22] : memref<1x128xf32, #tpu.memory_space<vmem>>, vector<1x128xf32>
    %c0_23 = arith.constant 0 : index
    %c0_24 = arith.constant 0 : index
    %24 = vector.load %arg12[%c0_23, %c0_24] : memref<1x128xf32, #tpu.memory_space<vmem>>, vector<1x128xf32>
    %25 = vector.broadcast %23 : vector<1x128xf32> to vector<8x128xf32>
    %26 = arith.addf %25, %6 : vector<8x128xf32>
    %27 = arith.maximumf %22, %26 : vector<8x128xf32>
    %28 = arith.subf %22, %27 : vector<8x128xf32>
    %29 = math.exp %28 : vector<8x128xf32>
    %30 = arith.subf %26, %27 : vector<8x128xf32>
    %31 = math.exp %30 : vector<8x128xf32>
    %32 = arith.mulf %29, %20 : vector<8x128xf32>
    %33 = arith.mulf %31, %10 : vector<8x128xf32>
    %34 = arith.addf %32, %33 : vector<8x128xf32>
    %35 = arith.mulf %29, %21 : vector<8x128xf32>
    %36 = arith.addf %35, %31 : vector<8x128xf32>
    %37 = vector.broadcast %24 : vector<1x128xf32> to vector<8x128xf32>
    %38 = arith.addf %22, %37 : vector<8x128xf32>
    %39 = arith.maximumf %38, %6 : vector<8x128xf32>
    %40 = arith.subf %38, %39 : vector<8x128xf32>
    %41 = math.exp %40 : vector<8x128xf32>
    %42 = arith.subf %6, %39 : vector<8x128xf32>
    %43 = math.exp %42 : vector<8x128xf32>
    %44 = arith.mulf %41, %20 : vector<8x128xf32>
    %45 = arith.mulf %43, %10 : vector<8x128xf32>
    %46 = arith.addf %44, %45 : vector<8x128xf32>
    %c0_25 = arith.constant 0 : index
    %c0_26 = arith.constant 0 : index
    %47 = vector.load %arg18[%c0_25, %c0_26] : memref<8x128xf32, #tpu.memory_space<vmem>>, vector<8x128xf32>
    tpu.vector_store %arg18[%c0_25, %c0_26], %46 {strides = array<i32>} : memref<8x128xf32, #tpu.memory_space<vmem>>, vector<8x128xf32>,
    %48 = arith.mulf %41, %21 : vector<8x128xf32>
    %49 = arith.addf %48, %43 : vector<8x128xf32>
    %c0_27 = arith.constant 0 : index
    %c0_28 = arith.constant 0 : index
    %50 = vector.load %arg19[%c0_27, %c0_28] : memref<8x128xf32, #tpu.memory_space<vmem>>, vector<8x128xf32>
    tpu.vector_store %arg19[%c0_27, %c0_28], %49 {strides = array<i32>} : memref<8x128xf32, #tpu.memory_space<vmem>>, vector<8x128xf32>,
    %c0_29 = arith.constant 0 : index
    %c0_30 = arith.constant 0 : index
    %51 = vector.load %arg20[%c0_29, %c0_30] : memref<8x128xf32, #tpu.memory_space<vmem>>, vector<8x128xf32>
    tpu.vector_store %arg20[%c0_29, %c0_30], %39 {strides = array<i32>} : memref<8x128xf32, #tpu.memory_space<vmem>>, vector<8x128xf32>,
    %52 = arith.mulf %19, %34 : vector<8x128xf32>
    %53 = tpu.reciprocal %36 {approx = true} : vector<8x128xf32> -> vector<8x128xf32>
    %54 = arith.mulf %52, %53 : vector<8x128xf32>
    %c0_31 = arith.constant 0 : index
    %c0_32 = arith.constant 0 : index
    %55 = vector.load %arg25[%c0_31, %c0_32] : memref<8x256xf32, #tpu.memory_space<vmem>>, vector<8x256xf32>
    %56 = arith.truncf %54 : vector<8x128xf32> to vector<8x128xbf16>
    %c0_33 = arith.constant 0 : index
    %c0_34 = arith.constant 0 : index
    %57 = vector.load %arg16[%c0_33, %c0_34] : memref<128x256xbf16, #tpu.memory_space<vmem>>, vector<128x256xbf16>
    %cst_35 = arith.constant dense<0.000000e+00> : vector<8x256xf32>
    %58 = tpu.matmul %56, %57, %cst_35 {dimension_numbers = #tpu.dot_dimension_numbers<[1], [0], [0], [1], [0, 0, 1, 1], [], []>} : vector<8x128xbf16>, vector<128x256xbf16>, vector<8x256xf32> -> vector<8x256xf32>
    %59 = arith.addf %55, %58 : vector<8x256xf32>
    %c0_36 = arith.constant 0 : index
    %c0_37 = arith.constant 0 : index
    %60 = vector.load %arg25[%c0_36, %c0_37] : memref<8x256xf32, #tpu.memory_space<vmem>>, vector<8x256xf32>
    tpu.vector_store %arg25[%c0_36, %c0_37], %59 {strides = array<i32>} : memref<8x256xf32, #tpu.memory_space<vmem>>, vector<8x256xf32>,
    %c1_i32 = arith.constant 1 : i32
    %61 = arith.cmpi eq, %arg0, %c1_i32 : i32
    %62 = arith.extui %61 : i1 to i32
    %c0_i32_38 = arith.constant 0 : i32
    %63 = arith.cmpi ne, %62, %c0_i32_38 : i32
    scf.if %63 {
      %c0_39 = arith.constant 0 : index
      %c0_40 = arith.constant 0 : index
      %64 = vector.load %arg1[%c0_39, %c0_40] : memref<8x256xf32, #tpu.memory_space<vmem>>, vector<8x256xf32>
      %c0_41 = arith.constant 0 : index
      %c0_42 = arith.constant 0 : index
      %65 = vector.load %arg25[%c0_41, %c0_42] : memref<8x256xf32, #tpu.memory_space<vmem>>, vector<8x256xf32>
      %66 = arith.addf %64, %65 : vector<8x256xf32>
      %c0_43 = arith.constant 0 : index
      %c0_44 = arith.constant 0 : index
      %67 = vector.load %arg17[%c0_43, %c0_44] : memref<8x256xf32, #tpu.memory_space<vmem>>, vector<8x256xf32>
      tpu.vector_store %arg17[%c0_43, %c0_44], %66 {strides = array<i32>} : memref<8x256xf32, #tpu.memory_space<vmem>>, vector<8x256xf32>,
    } else {
    }
    return
  }
  func.func @transform_0(%arg0: i32) -> (i32, i32) {
    %c0_i32 = arith.constant 0 : i32
    %c0_i32_0 = arith.constant 0 : i32
    %c0_i32_1 = arith.constant 0 : i32
    return %c0_i32, %c0_i32_0 : i32, i32
  }
  func.func @transform_1(%arg0: i32) -> (i32, i32) {
    %c0_i32 = arith.constant 0 : i32
    %c0_i32_0 = arith.constant 0 : i32
    return %c0_i32, %arg0 : i32, i32
  }
  func.func @transform_2(%arg0: i32) -> (i32, i32) {
    %c0_i32 = arith.constant 0 : i32
    %c0_i32_0 = arith.constant 0 : i32
    return %c0_i32, %arg0 : i32, i32
  }
  func.func @transform_3(%arg0: i32) -> (i32, i32) {
    %c0_i32 = arith.constant 0 : i32
    %c0_i32_0 = arith.constant 0 : i32
    return %c0_i32, %arg0 : i32, i32
  }
  func.func @transform_4(%arg0: i32) -> (i32, i32) {
    %c0_i32 = arith.constant 0 : i32
    %c0_i32_0 = arith.constant 0 : i32
    %c0_i32_1 = arith.constant 0 : i32
    return %c0_i32, %c0_i32_0 : i32, i32
  }
  func.func @transform_5(%arg0: i32) -> (i32, i32) {
    %c0_i32 = arith.constant 0 : i32
    %c0_i32_0 = arith.constant 0 : i32
    %c0_i32_1 = arith.constant 0 : i32
    return %c0_i32, %c0_i32_0 : i32, i32
  }
  func.func @transform_6(%arg0: i32) -> (i32, i32) {
    %c0_i32 = arith.constant 0 : i32
    %c0_i32_0 = arith.constant 0 : i32
    %c0_i32_1 = arith.constant 0 : i32
    return %c0_i32, %c0_i32_0 : i32, i32
  }
  func.func @transform_7(%arg0: i32) -> (i32, i32) {
    %c0_i32 = arith.constant 0 : i32
    %c0_i32_0 = arith.constant 0 : i32
    %c0_i32_1 = arith.constant 0 : i32
    return %c0_i32, %c0_i32_0 : i32, i32
  }
  func.func @transform_8(%arg0: i32) -> (i32, i32) {
    %c0_i32 = arith.constant 0 : i32
    %c0_i32_0 = arith.constant 0 : i32
    %c0_i32_1 = arith.constant 0 : i32
    return %c0_i32, %c0_i32_0 : i32, i32
  }
  func.func @transform_9(%arg0: i32) -> (i32, i32) {
    %c0_i32 = arith.constant 0 : i32
    %c0_i32_0 = arith.constant 0 : i32
    %c0_i32_1 = arith.constant 0 : i32
    return %c0_i32, %c0_i32_0 : i32, i32
  }
  func.func @transform_10(%arg0: i32) -> (i32, i32) {
    %c0_i32 = arith.constant 0 : i32
    %c0_i32_0 = arith.constant 0 : i32
    return %c0_i32, %arg0 : i32, i32
  }
  func.func @transform_11(%arg0: i32) -> (i32, i32) {
    %c0_i32 = arith.constant 0 : i32
    %c0_i32_0 = arith.constant 0 : i32
    return %c0_i32, %arg0 : i32, i32
  }
  func.func @transform_12(%arg0: i32) -> (i32, i32) {
    %c0_i32 = arith.constant 0 : i32
    %c0_i32_0 = arith.constant 0 : i32
    return %c0_i32, %arg0 : i32, i32
  }
  func.func @transform_13(%arg0: i32) -> (i32, i32) {
    %c0_i32 = arith.constant 0 : i32
    %c0_i32_0 = arith.constant 0 : i32
    return %c0_i32, %arg0 : i32, i32
  }
  func.func @transform_14(%arg0: i32) -> (i32, i32) {
    %c0_i32 = arith.constant 0 : i32
    %c0_i32_0 = arith.constant 0 : i32
    return %c0_i32, %arg0 : i32, i32
  }
  func.func @transform_15(%arg0: i32) -> (i32, i32) {
    %c0_i32 = arith.constant 0 : i32
    %c0_i32_0 = arith.constant 0 : i32
    return %arg0, %c0_i32 : i32, i32
  }
  func.func @transform_16(%arg0: i32) -> (i32, i32) {
    %c0_i32 = arith.constant 0 : i32
    %c0_i32_0 = arith.constant 0 : i32
    %c0_i32_1 = arith.constant 0 : i32
    return %c0_i32, %c0_i32_0 : i32, i32
  }
  func.func @transform_17(%arg0: i32) -> (i32, i32) {
    %c0_i32 = arith.constant 0 : i32
    %c0_i32_0 = arith.constant 0 : i32
    return %c0_i32, %arg0 : i32, i32
  }
  func.func @transform_18(%arg0: i32) -> (i32, i32) {
    %c0_i32 = arith.constant 0 : i32
    %c0_i32_0 = arith.constant 0 : i32
    return %c0_i32, %arg0 : i32, i32
  }
  func.func @transform_19(%arg0: i32) -> (i32, i32) {
    %c0_i32 = arith.constant 0 : i32
    %c0_i32_0 = arith.constant 0 : i32
    return %c0_i32, %arg0 : i32, i32
  }
  func.func @transform_20(%arg0: i32) -> (i32, i32) {
    %c0_i32 = arith.constant 0 : i32
    %c0_i32_0 = arith.constant 0 : i32
    %c0_i32_1 = arith.constant 0 : i32
    return %c0_i32, %c0_i32_0 : i32, i32
  }
}

module attributes {stable_mosaic.version = 11 : i64} {
  func.func @_channelmix_kernel(%arg0: i32, %arg1: memref<8x256xf32, #tpu.memory_space<vmem>>, %arg2: memref<8x256xf32, #tpu.memory_space<vmem>>, %arg3: memref<1x256xf32, #tpu.memory_space<vmem>>, %arg4: memref<1x256xf32, #tpu.memory_space<vmem>>, %arg5: memref<1x256xf32, #tpu.memory_space<vmem>>, %arg6: memref<1x256xf32, #tpu.memory_space<vmem>>, %arg7: memref<256x256xbf16, #tpu.memory_space<vmem>>, %arg8: memref<256x128xbf16, #tpu.memory_space<vmem>>, %arg9: memref<256x256xbf16, #tpu.memory_space<vmem>>, %arg10: memref<8x256xf32, #tpu.memory_space<vmem>>, %arg11: memref<8x256xf32, #tpu.memory_space<vmem>>, %arg12: memref<8x256xf32, #tpu.memory_space<vmem>>, %arg13: memref<8x256xf32, #tpu.memory_space<vmem>>, %arg14: memref<8x256xf32, #tpu.memory_space<vmem>>, %arg15: memref<8x256xf32, #tpu.memory_space<vmem>>) attributes {dimension_semantics = [#tpu.dimension_semantics<arbitrary>], iteration_bounds = array<i64: 2>, scalar_prefetch = 0 : i64, scratch_operands = 4 : i64, tpu.core_type = #tpu.core_type<tc>, window_params = [{pipeline_mode = #tpu.pipeline_mode<synchronous>, transform_indices = @transform_0, window_bounds = array<i64: 8, 256>}, {pipeline_mode = #tpu.pipeline_mode<synchronous>, transform_indices = @transform_1, window_bounds = array<i64: 8, 256>}, {pipeline_mode = #tpu.pipeline_mode<synchronous>, transform_indices = @transform_2, window_bounds = array<i64: 1, 256>}, {pipeline_mode = #tpu.pipeline_mode<synchronous>, transform_indices = @transform_3, window_bounds = array<i64: 1, 256>}, {pipeline_mode = #tpu.pipeline_mode<synchronous>, transform_indices = @transform_4, window_bounds = array<i64: 1, 256>}, {pipeline_mode = #tpu.pipeline_mode<synchronous>, transform_indices = @transform_5, window_bounds = array<i64: 1, 256>}, {transform_indices = @transform_6, window_bounds = array<i64: 256, 256>}, {transform_indices = @transform_7, window_bounds = array<i64: 256, 128>}, {transform_indices = @transform_8, window_bounds = array<i64: 256, 256>}, {pipeline_mode = #tpu.pipeline_mode<synchronous>, transform_indices = @transform_9, window_bounds = array<i64: 8, 256>}, {pipeline_mode = #tpu.pipeline_mode<synchronous>, transform_indices = @transform_10, window_bounds = array<i64: 8, 256>}]} {
    %c0_i32 = arith.constant 0 : i32
    %0 = arith.cmpi eq, %arg0, %c0_i32 : i32
    %1 = arith.extui %0 : i1 to i32
    %c0_i32_0 = arith.constant 0 : i32
    %2 = arith.cmpi ne, %1, %c0_i32_0 : i32
    scf.if %2 {
      %c0_20 = arith.constant 0 : index
      %c0_21 = arith.constant 0 : index
      %32 = vector.load %arg1[%c0_20, %c0_21] : memref<8x256xf32, #tpu.memory_space<vmem>>, vector<8x256xf32>
      %c0_22 = arith.constant 0 : index
      %c0_23 = arith.constant 0 : index
      %33 = vector.load %arg3[%c0_22, %c0_23] : memref<1x256xf32, #tpu.memory_space<vmem>>, vector<1x256xf32>
      %c0_24 = arith.constant 0 : index
      %c0_25 = arith.constant 0 : index
      %34 = vector.load %arg4[%c0_24, %c0_25] : memref<1x256xf32, #tpu.memory_space<vmem>>, vector<1x256xf32>
      %cst_26 = arith.constant dense<0.000000e+00> : vector<8xf32>
      %35 = vector.multi_reduction <add>, %32, %cst_26 [1] : vector<8x256xf32> to vector<8xf32>
      %36 = vector.shape_cast %35 : vector<8xf32> to vector<8x1xf32>
      %cst_27 = arith.constant 2.560000e+02 : f32
      %37 = vector.broadcast %cst_27 : f32 to vector<8x1xf32>
      %38 = arith.divf %36, %37 : vector<8x1xf32>
      %39 = vector.broadcast %38 : vector<8x1xf32> to vector<8x256xf32>
      %40 = arith.subf %32, %39 : vector<8x256xf32>
      %41 = arith.mulf %40, %40 : vector<8x256xf32>
      %cst_28 = arith.constant dense<0.000000e+00> : vector<8xf32>
      %42 = vector.multi_reduction <add>, %41, %cst_28 [1] : vector<8x256xf32> to vector<8xf32>
      %43 = vector.shape_cast %42 : vector<8xf32> to vector<8x1xf32>
      %cst_29 = arith.constant 2.560000e+02 : f32
      %44 = vector.broadcast %cst_29 : f32 to vector<8x1xf32>
      %45 = arith.divf %43, %44 : vector<8x1xf32>
      %46 = vector.broadcast %38 : vector<8x1xf32> to vector<8x256xf32>
      %47 = arith.subf %32, %46 : vector<8x256xf32>
      %cst_30 = arith.constant 9.99999974E-6 : f32
      %48 = vector.broadcast %cst_30 : f32 to vector<8x1xf32>
      %49 = arith.addf %45, %48 : vector<8x1xf32>
      %50 = math.rsqrt %49 : vector<8x1xf32>
      %51 = vector.broadcast %50 : vector<8x1xf32> to vector<8x256xf32>
      %52 = arith.mulf %47, %51 : vector<8x256xf32>
      %53 = vector.broadcast %33 : vector<1x256xf32> to vector<8x256xf32>
      %54 = arith.mulf %52, %53 : vector<8x256xf32>
      %55 = vector.broadcast %34 : vector<1x256xf32> to vector<8x256xf32>
      %56 = arith.addf %54, %55 : vector<8x256xf32>
      %c0_31 = arith.constant 0 : index
      %c0_32 = arith.constant 0 : index
      %57 = vector.load %arg2[%c0_31, %c0_32] : memref<8x256xf32, #tpu.memory_space<vmem>>, vector<8x256xf32>
      %c0_33 = arith.constant 0 : index
      %c0_34 = arith.constant 0 : index
      %58 = vector.load %arg5[%c0_33, %c0_34] : memref<1x256xf32, #tpu.memory_space<vmem>>, vector<1x256xf32>
      %c0_35 = arith.constant 0 : index
      %c0_36 = arith.constant 0 : index
      %59 = vector.load %arg6[%c0_35, %c0_36] : memref<1x256xf32, #tpu.memory_space<vmem>>, vector<1x256xf32>
      %c0_37 = arith.constant 0 : index
      %c0_38 = arith.constant 0 : index
      %60 = vector.load %arg11[%c0_37, %c0_38] : memref<8x256xf32, #tpu.memory_space<vmem>>, vector<8x256xf32>
      tpu.vector_store %arg11[%c0_37, %c0_38], %56 {strides = array<i32>} : memref<8x256xf32, #tpu.memory_space<vmem>>, vector<8x256xf32>,
      %61 = vector.broadcast %58 : vector<1x256xf32> to vector<8x256xf32>
      %62 = arith.mulf %56, %61 : vector<8x256xf32>
      %cst_39 = arith.constant 1.000000e+00 : f32
      %63 = vector.broadcast %cst_39 : f32 to vector<1x256xf32>
      %64 = arith.subf %63, %58 : vector<1x256xf32>
      %65 = vector.broadcast %64 : vector<1x256xf32> to vector<8x256xf32>
      %66 = arith.mulf %57, %65 : vector<8x256xf32>
      %67 = arith.addf %62, %66 : vector<8x256xf32>
      %c0_40 = arith.constant 0 : index
      %c0_41 = arith.constant 0 : index
      %68 = vector.load %arg12[%c0_40, %c0_41] : memref<8x256xf32, #tpu.memory_space<vmem>>, vector<8x256xf32>
      tpu.vector_store %arg12[%c0_40, %c0_41], %67 {strides = array<i32>} : memref<8x256xf32, #tpu.memory_space<vmem>>, vector<8x256xf32>,
      %69 = vector.broadcast %59 : vector<1x256xf32> to vector<8x256xf32>
      %70 = arith.mulf %56, %69 : vector<8x256xf32>
      %cst_42 = arith.constant 1.000000e+00 : f32
      %71 = vector.broadcast %cst_42 : f32 to vector<1x256xf32>
      %72 = arith.subf %71, %59 : vector<1x256xf32>
      %73 = vector.broadcast %72 : vector<1x256xf32> to vector<8x256xf32>
      %74 = arith.mulf %57, %73 : vector<8x256xf32>
      %75 = arith.addf %70, %74 : vector<8x256xf32>
      %c0_43 = arith.constant 0 : index
      %c0_44 = arith.constant 0 : index
      %76 = vector.load %arg13[%c0_43, %c0_44] : memref<8x256xf32, #tpu.memory_space<vmem>>, vector<8x256xf32>
      tpu.vector_store %arg13[%c0_43, %c0_44], %75 {strides = array<i32>} : memref<8x256xf32, #tpu.memory_space<vmem>>, vector<8x256xf32>,
      %cst_45 = arith.constant 0.000000e+00 : f32
      %77 = vector.broadcast %cst_45 : f32 to vector<8x256xf32>
      %c0_46 = arith.constant 0 : index
      %c0_47 = arith.constant 0 : index
      %78 = vector.load %arg15[%c0_46, %c0_47] : memref<8x256xf32, #tpu.memory_space<vmem>>, vector<8x256xf32>
      tpu.vector_store %arg15[%c0_46, %c0_47], %77 {strides = array<i32>} : memref<8x256xf32, #tpu.memory_space<vmem>>, vector<8x256xf32>,
    } else {
    }
    %c0 = arith.constant 0 : index
    %c0_1 = arith.constant 0 : index
    %3 = vector.load %arg12[%c0, %c0_1] : memref<8x256xf32, #tpu.memory_space<vmem>>, vector<8x256xf32>
    %4 = arith.truncf %3 : vector<8x256xf32> to vector<8x256xbf16>
    %c0_2 = arith.constant 0 : index
    %c0_3 = arith.constant 0 : index
    %5 = vector.load %arg7[%c0_2, %c0_3] : memref<256x256xbf16, #tpu.memory_space<vmem>>, vector<256x256xbf16>
    %cst = arith.constant dense<0.000000e+00> : vector<8x256xf32>
    %6 = tpu.matmul %4, %5, %cst {dimension_numbers = #tpu.dot_dimension_numbers<[1], [0], [0], [1], [0, 0, 1, 1], [], []>} : vector<8x256xbf16>, vector<256x256xbf16>, vector<8x256xf32> -> vector<8x256xf32>
    %cst_4 = arith.constant 0.000000e+00 : f32
    %7 = vector.broadcast %cst_4 : f32 to vector<8x256xf32>
    %8 = arith.maximumf %6, %7 : vector<8x256xf32>
    %9 = arith.mulf %8, %8 : vector<8x256xf32>
    %c0_5 = arith.constant 0 : index
    %c0_6 = arith.constant 0 : index
    %10 = vector.load %arg15[%c0_5, %c0_6] : memref<8x256xf32, #tpu.memory_space<vmem>>, vector<8x256xf32>
    %11 = arith.truncf %9 : vector<8x256xf32> to vector<8x256xbf16>
    %c0_7 = arith.constant 0 : index
    %c0_8 = arith.constant 0 : index
    %12 = vector.load %arg9[%c0_7, %c0_8] : memref<256x256xbf16, #tpu.memory_space<vmem>>, vector<256x256xbf16>
    %cst_9 = arith.constant dense<0.000000e+00> : vector<8x256xf32>
    %13 = tpu.matmul %11, %12, %cst_9 {dimension_numbers = #tpu.dot_dimension_numbers<[1], [0], [0], [1], [0, 0, 1, 1], [], []>} : vector<8x256xbf16>, vector<256x256xbf16>, vector<8x256xf32> -> vector<8x256xf32>
    %14 = arith.addf %10, %13 : vector<8x256xf32>
    %c0_10 = arith.constant 0 : index
    %c0_11 = arith.constant 0 : index
    %15 = vector.load %arg15[%c0_10, %c0_11] : memref<8x256xf32, #tpu.memory_space<vmem>>, vector<8x256xf32>
    tpu.vector_store %arg15[%c0_10, %c0_11], %14 {strides = array<i32>} : memref<8x256xf32, #tpu.memory_space<vmem>>, vector<8x256xf32>,
    %c128_i32 = arith.constant 128 : i32
    %16 = arith.muli %arg0, %c128_i32 : i32
    %17 = tpu.assume_multiple %16, 128 : i32
    %c0_12 = arith.constant 0 : index
    %c0_13 = arith.constant 0 : index
    %18 = vector.load %arg13[%c0_12, %c0_13] : memref<8x256xf32, #tpu.memory_space<vmem>>, vector<8x256xf32>
    %19 = arith.truncf %18 : vector<8x256xf32> to vector<8x256xbf16>
    %c0_14 = arith.constant 0 : index
    %c0_15 = arith.constant 0 : index
    %20 = vector.load %arg8[%c0_14, %c0_15] : memref<256x128xbf16, #tpu.memory_space<vmem>>, vector<256x128xbf16>
    %cst_16 = arith.constant dense<0.000000e+00> : vector<8x128xf32>
    %21 = tpu.matmul %19, %20, %cst_16 {dimension_numbers = #tpu.dot_dimension_numbers<[1], [0], [0], [1], [0, 0, 1, 1], [], []>} : vector<8x256xbf16>, vector<256x128xbf16>, vector<8x128xf32> -> vector<8x128xf32>
    %22 = arith.negf %21 : vector<8x128xf32>
    %23 = math.exp %22 : vector<8x128xf32>
    %cst_17 = arith.constant 1.000000e+00 : f32
    %24 = vector.broadcast %cst_17 : f32 to vector<8x128xf32>
    %25 = arith.addf %24, %23 : vector<8x128xf32>
    %26 = arith.divf %24, %25 : vector<8x128xf32>
    %c0_18 = arith.constant 0 : index
    %27 = arith.index_cast %17 : i32 to index
    %28 = vector.load %arg14[%c0_18, %27] : memref<8x256xf32, #tpu.memory_space<vmem>>, vector<8x128xf32>
    tpu.vector_store %arg14[%c0_18, %27], %26 {strides = array<i32>} : memref<8x256xf32, #tpu.memory_space<vmem>>, vector<8x128xf32>,
    %c1_i32 = arith.constant 1 : i32
    %29 = arith.cmpi eq, %arg0, %c1_i32 : i32
    %30 = arith.extui %29 : i1 to i32
    %c0_i32_19 = arith.constant 0 : i32
    %31 = arith.cmpi ne, %30, %c0_i32_19 : i32
    scf.if %31 {
      %c0_20 = arith.constant 0 : index
      %c0_21 = arith.constant 0 : index
      %32 = vector.load %arg1[%c0_20, %c0_21] : memref<8x256xf32, #tpu.memory_space<vmem>>, vector<8x256xf32>
      %c0_22 = arith.constant 0 : index
      %c0_23 = arith.constant 0 : index
      %33 = vector.load %arg14[%c0_22, %c0_23] : memref<8x256xf32, #tpu.memory_space<vmem>>, vector<8x256xf32>
      %c0_24 = arith.constant 0 : index
      %c0_25 = arith.constant 0 : index
      %34 = vector.load %arg15[%c0_24, %c0_25] : memref<8x256xf32, #tpu.memory_space<vmem>>, vector<8x256xf32>
      %35 = arith.mulf %33, %34 : vector<8x256xf32>
      %36 = arith.addf %32, %35 : vector<8x256xf32>
      %c0_26 = arith.constant 0 : index
      %c0_27 = arith.constant 0 : index
      %37 = vector.load %arg10[%c0_26, %c0_27] : memref<8x256xf32, #tpu.memory_space<vmem>>, vector<8x256xf32>
      tpu.vector_store %arg10[%c0_26, %c0_27], %36 {strides = array<i32>} : memref<8x256xf32, #tpu.memory_space<vmem>>, vector<8x256xf32>,
    } else {
    }
    return
  }
  func.func @transform_0(%arg0: i32) -> (i32, i32) {
    %c0_i32 = arith.constant 0 : i32
    %c0_i32_0 = arith.constant 0 : i32
    %c0_i32_1 = arith.constant 0 : i32
    return %c0_i32, %c0_i32_0 : i32, i32
  }
  func.func @transform_1(%arg0: i32) -> (i32, i32) {
    %c0_i32 = arith.constant 0 : i32
    %c0_i32_0 = arith.constant 0 : i32
    %c0_i32_1 = arith.constant 0 : i32
    return %c0_i32, %c0_i32_0 : i32, i32
  }
  func.func @transform_2(%arg0: i32) -> (i32, i32) {
    %c0_i32 = arith.constant 0 : i32
    %c0_i32_0 = arith.constant 0 : i32
    %c0_i32_1 = arith.constant 0 : i32
    return %c0_i32, %c0_i32_0 : i32, i32
  }
  func.func @transform_3(%arg0: i32) -> (i32, i32) {
    %c0_i32 = arith.constant 0 : i32
    %c0_i32_0 = arith.constant 0 : i32
    %c0_i32_1 = arith.constant 0 : i32
    return %c0_i32, %c0_i32_0 : i32, i32
  }
  func.func @transform_4(%arg0: i32) -> (i32, i32) {
    %c0_i32 = arith.constant 0 : i32
    %c0_i32_0 = arith.constant 0 : i32
    %c0_i32_1 = arith.constant 0 : i32
    return %c0_i32, %c0_i32_0 : i32, i32
  }
  func.func @transform_5(%arg0: i32) -> (i32, i32) {
    %c0_i32 = arith.constant 0 : i32
    %c0_i32_0 = arith.constant 0 : i32
    %c0_i32_1 = arith.constant 0 : i32
    return %c0_i32, %c0_i32_0 : i32, i32
  }
  func.func @transform_6(%arg0: i32) -> (i32, i32) {
    %c0_i32 = arith.constant 0 : i32
    %c0_i32_0 = arith.constant 0 : i32
    return %c0_i32, %arg0 : i32, i32
  }
  func.func @transform_7(%arg0: i32) -> (i32, i32) {
    %c0_i32 = arith.constant 0 : i32
    %c0_i32_0 = arith.constant 0 : i32
    return %c0_i32, %arg0 : i32, i32
  }
  func.func @transform_8(%arg0: i32) -> (i32, i32) {
    %c0_i32 = arith.constant 0 : i32
    %c0_i32_0 = arith.constant 0 : i32
    return %arg0, %c0_i32 : i32, i32
  }
  func.func @transform_9(%arg0: i32) -> (i32, i32) {
    %c0_i32 = arith.constant 0 : i32
    %c0_i32_0 = arith.constant 0 : i32
    %c0_i32_1 = arith.constant 0 : i32
    return %c0_i32, %c0_i32_0 : i32, i32
  }
  func.func @transform_10(%arg0: i32) -> (i32, i32) {
    %c0_i32 = arith.constant 0 : i32
    %c0_i32_0 = arith.constant 0 : i32
    %c0_i32_1 = arith.constant 0 : i32
    return %c0_i32, %c0_i32_0 : i32, i32
  }
}

</mosaic_0001>

<bundles_post_ra>
// kernel: block_script.2
= control target key start
LH: loop header
LB: loop body
LE: loop exit
PB: predicated region body
PF: predicated region fallthrough
CT: control target
= control target key end

     0   :  { %s3004_s0 = inlined_call_operand.vmem [shape: f32[8,256], index: 0, kind: input, shape index: {}]   ;;  %s3005_s1 = inlined_call_operand.vmem [shape: f32[8,256], index: 1, kind: input, shape index: {}, may-alias: {1,17}]   ;;  %s3006_s2 = inlined_call_operand.vmem [shape: f32[8,256], index: 2, kind: input, shape index: {}, may-alias: {2,18}]   ;;  %s3007_s3 = inlined_call_operand.vmem [shape: f32[8,256], index: 3, kind: input, shape index: {}, may-alias: {3,19}]   ;;  %s3008_s4 = inlined_call_operand.vmem [shape: f32[8,256], index: 4, kind: input, shape index: {}, may-alias: {4,20}]   ;;  %s3009_s5 = inlined_call_operand.vmem [shape: f32[1,256], index: 5, kind: input, shape index: {}]   ;;  %s3010_s6 = inlined_call_operand.vmem [shape: f32[1,256], index: 6, kind: input, shape index: {}]   ;;  %s3011_s7 = inlined_call_operand.vmem [shape: f32[1,256], index: 7, kind: input, shape index: {}]   ;;  %s3012_s8 = inlined_call_operand.vmem [shape: f32[1,256], index: 8, kind: input, shape index: {}]   ;;  %s3013_s9 = inlined_call_operand.vmem [shape: f32[1,256], index: 9, kind: input, shape index: {}]   ;;  %s3014_s10 = inlined_call_operand.vmem [shape: f32[1,256], index: 10, kind: input, shape index: {}]   ;;  %s3015_s11 = inlined_call_operand.vmem [shape: f32[1,256], index: 11, kind: input, shape index: {}]   ;;  %s3016_s12 = inlined_call_operand.hbm [shape: bf16[256,256], index: 12, kind: input, shape index: {}]   ;;  %s3017_s13 = inlined_call_operand.hbm [shape: bf16[256,256], index: 13, kind: input, shape index: {}]   ;;  %s3018_s14 = inlined_call_operand.hbm [shape: bf16[256,256], index: 14, kind: input, shape index: {}]   ;;  %s3019_s15 = inlined_call_operand.hbm [shape: bf16[256,256], index: 15, kind: input, shape index: {}]   ;;  %s3020_s16 = inlined_call_operand.vmem [shape: f32[8,256], index: 16, kind: output, shape index: {0}]   ;;  %s3021_s17 = inlined_call_operand.vmem [shape: f32[8,256], index: 17, kind: output, shape index: {1}, may-alias: {1,17}]   ;;  %s3022_s18 = inlined_call_operand.vmem [shape: f32[8,256], index: 18, kind: output, shape index: {2}, may-alias: {2,18}]   ;;  %s3023_s19 = inlined_call_operand.vmem [shape: f32[8,256], index: 19, kind: output, shape index: {3}, may-alias: {3,19}]   ;;  %s3024_s20 = inlined_call_operand.vmem [shape: f32[8,256], index: 20, kind: output, shape index: {4}, may-alias: {4,20}]  }
   0x1   :  { %3041 = sst [smem:[#allocation20_spill]] %s3004_s0 }
   0x2   :  { %3042 = sst [smem:[#allocation21_spill]] %s3005_s1 }
   0x3   :  { %3043 = sst [smem:[#allocation22_spill]] %s3006_s2 }
   0x4   :  { %3044 = sst [smem:[#allocation23_spill]] %s3007_s3 }
   0x5   :  { %3045 = sst [smem:[#allocation24_spill]] %s3008_s4 }
   0x6   :  { %3046 = sst [smem:[#allocation25_spill]] %s3009_s5 }
   0x7   :  { %3047 = sst [smem:[#allocation26_spill]] %s3010_s6 }
   0x8   :  { %3048 = sst [smem:[#allocation27_spill]] %s3011_s7 }
   0x9   :  { %3049 = sst [smem:[#allocation28_spill]] %s3012_s8 }
   0xa   :  { %3050 = sst [smem:[#allocation29_spill]] %s3013_s9 }
   0xb   :  { %3051 = sst [smem:[#allocation30_spill]] %s3016_s12 }
   0xc   :  { %3052 = sst [smem:[#allocation31_spill]] %s3017_s13 }
   0xd   :  { %3053 = sst [smem:[#allocation32_spill]] %s3018_s14 }
   0xe   :  { %3054 = sst [smem:[#allocation33_spill]] %s3019_s15 }
   0xf   :  { %3055 = sst [smem:[#allocation34_spill]] %s3020_s16 }
  0x10   :  { %3056 = sst [smem:[#allocation35_spill]] %s3023_s19 }
  0x11   :  { %3057 = sst [smem:[#allocation36_spill]] %s3024_s20 }
  0x12   :  { %26 = vsyncpa [#allocation7], 0 }
  0x13   :  { %28 = vsyncpa [#allocation7 + $0x1], 0 }
  0x14   :  { %29 = vsyncpa [#allocation9], 0 }
  0x15   :  { %31 = vsyncpa [#allocation9 + $0x1], 0 }
  0x16   :  { %32 = vsyncpa [#allocation12], 0 }
  0x17   :  { %34 = vsyncpa [#allocation12 + $0x1], 0  ;;  %s2580_s1 = smov 0   ;;  %s2582_s22 = smov 0  }
  0x18   :  { %s2584_s23 = smov 0   ;;  %s2586_s24 = smov 0  }
  0x19 LB: > { %3058 = sst [smem:[#allocation16_spill]] %s2455_s22  ;;  %s2599_s2 = sadd.s32 4294967295, %s2463_s24   ;;  %s2463_s24 = sphi %s2586_s24, %s3098_s24   ;;  %s2459_s23 = sphi %s2584_s23, %s3101_s23   ;;  %s2455_s22 = sphi %s2582_s22, %s3100_s22   ;;  %s2451_s1 = sphi %s2580_s1, %s3099_s1  }
  0x1a   : > { %3059 = sst [smem:[#allocation17_spill]] %s2459_s23  ;;  %s2602_s25 = sadd.s32 1, %s2463_s24  }
  0x1b   : > { %3060 = sst [smem:[#allocation18_spill]] %s2602_s25  ;;  %s321_s3 = ssub.s32 %s2463_s24, %s2602_s25 }
  0x1c   : > { %s324_s26 = sadd.s32 1, %s2459_s23  ;;  %p322_p0 = scmp.eq.s32.totalorder %s321_s3, 0 }
  0x1d   : > { %p331_p1 = scmp.ne.s32.totalorder %s2459_s23, %s2455_s22  ;;  %p332_p2 = scmp.eq.s32.totalorder %s2463_s24, 0 }
  0x1e   : > { %p337_p3 = scmp.ne.s32.totalorder %s2455_s22, %s2451_s1  ;;  %p338_p5 = scmp.eq.s32.totalorder %s2599_s2, 0 }
  0x1f   : > { %s2612_s27 = scalar_select %p322_p0, %s2459_s23, %s324_s26  }
  0x20   : > { %p333_p4 = por %p332_p2, %p331_p1  ;;  %p2182_p6 = scmp.lt.s32.totalorder %s2463_s24, 2 }
  0x21   : > { %3061 = sst [smem:[#allocation19_spill]] %s2612_s27  ;;  %p2616_p7 = por %p338_p5, %p337_p3 }
  0x22   : > { %s2621_s4 = sand.u32 1, %s2459_s23   ;;  %s2627_s30 = sshll.u32 %s2463_s24, 6 }
  0x23   : > { %s3062_s28 = scalar_select %p2616_p7, 1, 0 }
  0x24   : > { %s2624_s29 = sshll.u32 %s2621_s4, 7  ;;  %p2629_p8 = pnand %p2182_p6, %p333_p4 }
  0x25   : > { %s633_s21 = sand.u32 1, %s2463_s24   ;;  %s3064_s13 = sld [smem:[#allocation31_spill]] }
  0x26   : > { %s637_s27 = scalar_lea.vmem [#allocation8], %s2624_s29  ;;  %s2644_s25 = scalar_lea.sflag [#allocation9], %s633_s21 }
  0x27   : > { %s643_s23 = sshll.u32 %s637_s27, 4  ;;  %p2650_p11 = pneg %p2629_p8  ;;  %s2641_s23 = int_to_ptr.vmem [resolvable:$true] %s643_s23 }
  0x2b   : > { %s2638_s26 = scalar_lea.hbm %s3064_s13, %s2627_s30  ;;  %s2314_s27 = scalar_lea.hbm %s3064_s13, 4096 }
  0x2c   : > { %s2309_s16 = scalar_lea.hbm %s2638_s26, 2048  ;;  %p2315_p0 = scmp.lt.s32.totalorder %s2638_s26, %s3064_s13 }
  0x2d   : > { %p2310_p10 = scmp.ne.s32.totalorder %s2638_s26, %s2309_s16  ;;  %p2316_p1 = scmp.lt.s32.totalorder %s2314_s27, %s2309_s16 }
  0x2f   : > { %p2312_p12 = pnand %p2650_p11, %p2310_p10  ;;  %p2317_p2 = por %p2316_p1, %p2315_p0 }
  0x31   : > { %p2313_p13 = pneg %p2312_p12 }
  0x33   : > { %p2318_p3 = pnand %p2317_p2, %p2313_p13 }
  0x35   : > { %2321 = shalt.err (!%p2318_p3)
}
  0x36   : > { %s2322_s21 = scalar_lea.vmem %s2641_s23, 2048  ;;  %s2465_s9 = smov [#allocation8]  }
  0x37   : > { %p2323_p4 = scmp.ne.s32.totalorder %s2641_s23, %s2322_s21  ;;  %s2327_s1 = sshll.u32 %s2465_s9, 4  ;;  %s2328_s1 = int_to_ptr.vmem [resolvable:$false] %s2327_s1 }
  0x38   : > { %s2329_s3 = scalar_lea.vmem %s2328_s1, 4096  ;;  %p2330_p10 = scmp.lt.s32.totalorder %s2641_s23, %s2328_s1 }
  0x39   : > { %p2325_p5 = pnand %p2323_p4, %p2650_p11  ;;  %p2331_p12 = scmp.lt.s32.totalorder %s2329_s3, %s2322_s21 }
  0x3b   : > { %p2326_p6 = pneg %p2325_p5  ;;  %p2332_p9 = por %p2331_p12, %p2330_p10 }
  0x3d   : > { %p2333_p7 = pnand %p2332_p9, %p2326_p6 }
  0x3f   : > { %2336 = shalt.err (!%p2333_p7)
}
  0x40   : > { %s3034_s5 = smov 128   ;;  %s3036_s6 = smov 64  }
  0x41   : > { %s3038_s9 = smov 4   ;;  %p693_p9 = scmp.lt.s32.totalorder %s2463_s24, 3 }
  0x42   : > { %2175 = dma.hbm_to_vmem [thread:$0]  (!%p2629_p8), %s2638_s26, 2048, %s2641_s23, %s2644_s25, %s3034_s5, %s3036_s6, %s3038_s9  }
  0x43   : > { %s3066_s12 = sld [smem:[#allocation30_spill]]  ;;  %p3067_p7 = scmp.ge.s32.totalorder %s2463_s24, 1 }
  0x44   : > { %s617_s3 = scalar_lea.vmem [#allocation6], %s2624_s29  ;;  %s614_s8 = scalar_lea.sflag [#allocation7], %s2621_s4 }
  0x45   : > { %p2685_p13 = pnand %p3067_p7, %p693_p9  ;;  %s623_s13 = sshll.u32 %s617_s3, 4  ;;  %s2690_s13 = int_to_ptr.vmem [resolvable:$true] %s623_s13 }
  0x47   : > { %s3068_s1 = scalar_select %p2685_p13, 1, 0 }
  0x49   : > { %s2681_s21 = scalar_lea.hbm %s3066_s12, %s2627_s30  ;;  %s2342_s27 = scalar_lea.hbm %s3066_s12, 4096 }
  0x4a   : > { %s2337_s23 = scalar_lea.hbm %s2681_s21, 2048  ;;  %p2343_p3 = scmp.lt.s32.totalorder %s2681_s21, %s3066_s12 }
  0x4b   : > { %p2338_p0 = scmp.ne.s32.totalorder %s2681_s21, %s2337_s23  ;;  %p2344_p4 = scmp.lt.s32.totalorder %s2342_s27, %s2337_s23 }
  0x4d   : > { %p2340_p1 = pnand %p2338_p0, %p2650_p11  ;;  %p2345_p5 = por %p2344_p4, %p2343_p3 }
  0x4f   : > { %p2341_p2 = pneg %p2340_p1 }
  0x51   : > { %p2346_p6 = pnand %p2345_p5, %p2341_p2 }
  0x53   : > { %2349 = shalt.err (!%p2346_p6)
}
  0x54   : > { %s2350_s3 = scalar_lea.vmem %s2690_s13, 2048  ;;  %s2469_s9 = smov [#allocation6]  }
  0x55   : > { %p2351_p10 = scmp.ne.s32.totalorder %s2690_s13, %s2350_s3  ;;  %s2355_s26 = sshll.u32 %s2469_s9, 4  ;;  %s2356_s26 = int_to_ptr.vmem [resolvable:$false] %s2355_s26 }
  0x56   : > { %s2357_s16 = scalar_lea.vmem %s2356_s26, 4096  ;;  %p2358_p7 = scmp.lt.s32.totalorder %s2690_s13, %s2356_s26 }
  0x57   : > { %p2353_p12 = pnand %p2351_p10, %p2650_p11  ;;  %p2359_p0 = scmp.lt.s32.totalorder %s2357_s16, %s2350_s3 }
  0x59   : > { %p2354_p9 = pneg %p2353_p12  ;;  %p2360_p1 = por %p2359_p0, %p2358_p7 }
  0x5b   : > { %p2361_p13 = pnand %p2360_p1, %p2354_p9 }
  0x5d   : > { %2364 = shalt.err (!%p2361_p13)
}
  0x5e   : > { %s3069_s5 = smov 4   ;;  %s3070_s6 = smov 64  }
  0x5f   : > { %s3071_s23 = smov 128   ;;  %s3072_s14 = sld [smem:[#allocation32_spill]] }
  0x60   : > { %2172 = dma.hbm_to_vmem [thread:$0]  (!%p2629_p8), %s2681_s21, 2048, %s2690_s13, %s614_s8, %s3071_s23, %s3070_s6, %s3069_s5  }
  0x61   : > { %s657_s3 = scalar_lea.vmem [#allocation10], %s2624_s29 }
  0x62   : > { %s663_s26 = sshll.u32 %s657_s3, 4  ;;  %s664_s26 = int_to_ptr.vmem [resolvable:$true] %s663_s26 }
  0x65   : > { %s2720_s12 = scalar_lea.hbm %s3072_s14, %s2627_s30  ;;  %s2370_s8 = scalar_lea.hbm %s3072_s14, 4096 }
  0x66   : > { %s2365_s16 = scalar_lea.hbm %s2720_s12, 2048  ;;  %p2371_p4 = scmp.lt.s32.totalorder %s2720_s12, %s3072_s14 }
  0x67   : > { %p2366_p13 = scmp.ne.s32.totalorder %s2720_s12, %s2365_s16  ;;  %p2372_p5 = scmp.lt.s32.totalorder %s2370_s8, %s2365_s16 }
  0x69   : > { %p2368_p2 = pnand %p2366_p13, %p2650_p11  ;;  %p2373_p6 = por %p2372_p5, %p2371_p4 }
  0x6b   : > { %p2369_p3 = pneg %p2368_p2 }
  0x6d   : > { %p2374_p10 = pnand %p2373_p6, %p2369_p3 }
  0x6f   : > { %2377 = shalt.err (!%p2374_p10)
}
  0x70   : > { %s2378_s30 = scalar_lea.vmem %s664_s26, 2048  ;;  %s2470_s27 = smov [#allocation10]  }
  0x71   : > { %p2379_p12 = scmp.ne.s32.totalorder %s664_s26, %s2378_s30  ;;  %s2383_s9 = sshll.u32 %s2470_s27, 4  ;;  %s2384_s9 = int_to_ptr.vmem [resolvable:$false] %s2383_s9 }
  0x72   : > { %s2385_s3 = scalar_lea.vmem %s2384_s9, 4096  ;;  %p2386_p0 = scmp.lt.s32.totalorder %s664_s26, %s2384_s9 }
  0x73   : > { %p2381_p9 = pnand %p2379_p12, %p2650_p11  ;;  %p2387_p1 = scmp.lt.s32.totalorder %s2385_s3, %s2378_s30 }
  0x75   : > { %p2382_p7 = pneg %p2381_p9  ;;  %p2388_p13 = por %p2387_p1, %p2386_p0 }
  0x77   : > { %p2389_p2 = pnand %p2388_p13, %p2382_p7 }
  0x79   : > { %2392 = shalt.err (!%p2389_p2)
}
  0x7a   : > { %2178 = dma.hbm_to_vmem [thread:$0]  (!%p2629_p8), %s2720_s12, 2048, %s664_s26, %s2644_s25, %s3071_s23, %s3070_s6, %s3069_s5  }
  0x7b   : > { %s2094_s7 = sshll.u32 %s2463_s24, 11  ;;  %s3073_s15 = sld [smem:[#allocation33_spill]] }
  0x7c   : > { %s677_s13 = scalar_lea.vmem [#allocation11], %s2624_s29  ;;  %s674_s30 = scalar_lea.sflag [#allocation12], %s2621_s4 }
  0x7d   : > { %s685_s21 = sshll.u32 %s677_s13, 4  ;;  %s2750_s21 = int_to_ptr.vmem [resolvable:$true] %s685_s21 }
  0x81   : > { %s2747_s8 = scalar_lea.hbm %s3073_s15, %s2094_s7  ;;  %s2398_s25 = scalar_lea.hbm %s3073_s15, 4096 }
  0x82   : > { %s2393_s27 = scalar_lea.hbm %s2747_s8, 2048  ;;  %p2399_p6 = scmp.lt.s32.totalorder %s2747_s8, %s3073_s15 }
  0x83   : > { %p2394_p3 = scmp.ne.s32.totalorder %s2747_s8, %s2393_s27  ;;  %p2400_p10 = scmp.lt.s32.totalorder %s2398_s25, %s2393_s27 }
  0x85   : > { %p2396_p4 = pnand %p2394_p3, %p2650_p11  ;;  %p2401_p12 = por %p2400_p10, %p2399_p6 }
  0x87   : > { %p2397_p5 = pneg %p2396_p4 }
  0x89   : > { %p2402_p9 = pnand %p2401_p12, %p2397_p5 }
  0x8b   : > { %2405 = shalt.err (!%p2402_p9)
}
  0x8c   : > { %s2406_s29 = scalar_lea.vmem %s2750_s21, 2048  ;;  %s2471_s26 = smov [#allocation11]  }
  0x8d   : > { %p2407_p7 = scmp.ne.s32.totalorder %s2750_s21, %s2406_s29  ;;  %s2411_s9 = sshll.u32 %s2471_s26, 4  ;;  %s2412_s9 = int_to_ptr.vmem [resolvable:$false] %s2411_s9 }
  0x8e   : > { %s2413_s3 = scalar_lea.vmem %s2412_s9, 4096  ;;  %p2414_p13 = scmp.lt.s32.totalorder %s2750_s21, %s2412_s9 }
  0x8f   : > { %p2409_p0 = pnand %p2407_p7, %p2650_p11  ;;  %p2415_p2 = scmp.lt.s32.totalorder %s2413_s3, %s2406_s29 }
  0x91   : > { %p2410_p1 = pneg %p2409_p0  ;;  %p2416_p3 = por %p2415_p2, %p2414_p13 }
  0x93   : > { %p2417_p4 = pnand %p2416_p3, %p2410_p1 }
  0x95   : > { %2420 = shalt.err (!%p2417_p4)
}
  0x96   : > { %s2472_s7 = smov 8   ;;  %p3074_p11 = scmp.ne.s32.totalorder %s3068_s1, 0 }
  0x97   : > { %2181 = dma.hbm_to_vmem [thread:$0]  (!%p2629_p8), %s2747_s8, 2048, %s2750_s21, %s674_s30, %s3071_s23, %s3071_s23, %s2472_s7  }
  0x98   : > { %697 = sbr.rel (%p3074_p11) target bundleno = 1002 (0x3ea), region = 84  ;;  %s699_s20 = sand.u32 (!%p3074_p11), 1, %s2455_s22  }
  0x99   : > { %s2012_s19 = sshll.u32 (!%p3074_p11), %s699_s20, 7  ;;  %s700_s16 = scalar_lea.sflag (!%p3074_p11), [#allocation7], %s699_s20 }
  0x9a   : > { %s2780_s13 = scalar_lea.vmem (!%p3074_p11), [#allocation6], %s2012_s19  ;;  %p3075_p5 = scmp.ne.s32.totalorder (!%p3074_p11), %s3062_s28, 0 }
  0x9d   : > { %2438 = dma.done.wait (%p3075_p5), %s700_s16, 2048  }
  0x9e   : > { %2440 = vsyncadd (%p3075_p5), %s700_s16, 4294965248  ;;  %s708_s4 = sand.u32 1, %s2599_s2   ;;  %s2787_s23 = scalar_lea.vmem [#allocation8], %s2012_s19 }
  0x9f   : > { %s709_s0 = scalar_lea.sflag [#allocation9], %s708_s4 }
  0xa0   : > { %2442 = dma.done.wait (%p3075_p5), %s709_s0, 4096  }
  0xa1   : > { %2444 = vsyncadd (%p3075_p5), %s709_s0, 4294963200  ;;  %s2793_s1 = scalar_lea.vmem [#allocation10], %s2012_s19  ;;  %s727_s8 = scalar_lea.sflag [#allocation12], %s699_s20 }
  0xa2   : > { %s2795_s21 = scalar_lea.vmem [#allocation11], %s2012_s19 }
  0xa3   : > { %2446 = dma.done.wait (%p3075_p5), %s727_s8, 2048  }
  0xa4   : > { %2448 = vsyncadd (%p3075_p5), %s727_s8, 4294965248  ;;  %p827_p8 = scmp.lt.s32.totalorder %s2599_s2, 1  ;;  %s3076_s6 = sld [smem:[#allocation21_spill]] }
  0xa5   : > { %s3077_s3 = sld [smem:[#allocation22_spill]]  ;;  %p2022_p6 = scmp.ne.s32.totalorder %s2599_s2, 0 }
  0xa6   : > { %s2803_s30 = scalar_select %p827_p8, %s2599_s2, 1 }
  0xa7   : > { %s3078_s16 = sld [smem:[#allocation23_spill]] }
  0xa8   : > { %s2806_s27 = sshll.u32 %s2803_s30, 3  ;;  %s844_s12 = scalar_lea.vmem %s3015_s11, %s2803_s30 }
  0xa9   : > { %s3079_s26 = sld [smem:[#allocation35_spill]] }
  0xaa   : > { %s830_s29 = scalar_lea.vmem %s3076_s6, %s2806_s27  ;;  %s3080_s19 = sld [smem:[#allocation20_spill]] (!%p2022_p6) }
  0xab   : > { %s834_s7 = scalar_lea.vmem %s3077_s3, %s2806_s27  ;;  %862 = sbr.rel (%p2022_p6) target bundleno = 494 (0x1ee), region = 104 }
  0xac   : > { %s3081_s22 = sld [smem:[#allocation27_spill]] (!%p2022_p6) }
  0xad   : > { %s838_s4 = scalar_lea.vmem %s3078_s16, %s2806_s27  ;;  %s3082_s5 = sld [smem:[#allocation28_spill]] (!%p2022_p6) }
  0xae   : > { %s3083_s3 = sld [smem:[#allocation29_spill]] (!%p2022_p6) }
  0xaf   : > { %s857_s9 = scalar_lea.vmem %s3079_s26, %s2806_s27  ;;  %s3084_s16 = sld [smem:[#allocation25_spill]] (!%p2022_p6) }
  0xb0   : > { %v863_v0 = vld [vmem:[%s3080_s19] sm:$0xff]  ;;  %v864_v1 = vld [vmem:[%s3080_s19 + $0x8] sm:$0xff]  ;;  %v2473_v10 = vmov 0.0   ;;  %v885_v14 = vlaneseq  ;;  %s3085_s25 = sld [smem:[#allocation26_spill]] }
  0xb1   : > { %v867_v2 = vadd.f32 %v864_v1, %v863_v0  ;;  %1010 = vst [vmem:[#allocation5] sm:$0xff] %v2473_v10  ;;  %1011 = vst [vmem:[#allocation5 + $0x8] sm:$0xff] %v2473_v10  ;;  %s3088_s6 = sld [smem:[#allocation36_spill]] }
  0xb2   : > { %v886_v15 = vshrl.u32 %v885_v14, 7  ;;  %v912_v16 = vld [vmem:[%s3081_s22] sm:$0x3]  ;;  %s3086_s22 = sld [smem:[#allocation24_spill]] }
  0xb3   : > { %868 = vadd.xlane.f32.xlu0 %v867_v2  ;;  %v913_v17 = vld [vmem:[%s3082_s5] sm:$0x3]  ;;  %v930_v22 = vsub.f32 1.0, %v912_v16 }
  0xb4   : > { %v887_v18 = vsub.s32 0, %v886_v15  ;;  %v891_v19 = vsub.s32 1, %v886_v15  ;;  %v914_v20 = vld [vmem:[%s3083_s3] sm:$0x3]  ;;  %v961_v24 = vsub.f32 1.0, %v913_v17 }
  0xb5   : > { %v865_v21 = vld [vmem:[%s3084_s16] sm:$0x3]  ;;  %v992_v25 = vsub.f32 1.0, %v914_v20 }
  0xb6   : > { %v866_v23 = vld [vmem:[%s3085_s25] sm:$0x3]  ;;  %v888_v26 = vrot.slane %v865_v21, %v887_v18  ;;  %v892_v27 = vrot.slane %v865_v21, %v891_v19  ;;  %v935_v31 = vrot.slane %v930_v22, %v887_v18  ;;  %v939_v32 = vrot.slane %v930_v22, %v891_v19 }
  0xb7   : > { %v901_v29 = vrot.slane %v866_v23, %v887_v18  ;;  %v905_v30 = vrot.slane %v866_v23, %v891_v19  ;;  %v966_v35 = vrot.slane %v961_v24, %v887_v18  ;;  %v970_v36 = vrot.slane %v961_v24, %v891_v19 }
  0xb8   : > { %s3087_s8 = smov %s3086_s22  ;;  %v910_v33 = vld [vmem:[%s3086_s22] sm:$0xff]  ;;  %v921_v39 = vrot.slane %v912_v16, %v887_v18  ;;  %v925_v40 = vrot.slane %v912_v16, %v891_v19  ;;  %v997_v41 = vrot.slane %v992_v25, %v887_v18  ;;  %v1001_v42 = vrot.slane %v992_v25, %v891_v19 }
  0xb9   : > { %v911_v34 = vld [vmem:[%s3087_s8 + $0x8] sm:$0xff]  ;;  %v952_v43 = vrot.slane %v913_v17, %v887_v18  ;;  %v956_v44 = vrot.slane %v913_v17, %v891_v19  ;;  %v942_v47 = vmul.f32 %v935_v31, %v910_v33  ;;  %v983_v49 = vrot.slane %v914_v20, %v887_v18 }
  0xba   : > { %v943_v48 = vmul.f32 %v939_v32, %v911_v34  ;;  %v987_v50 = vrot.slane %v914_v20, %v891_v19  ;;  %v973_v51 = vmul.f32 %v966_v35, %v910_v33  ;;  %v974_v52 = vmul.f32 %v970_v36, %v911_v34 }
  0xbb   : > { %v1004_v55 = vmul.f32 %v997_v41, %v910_v33  ;;  %v1005_v56 = vmul.f32 %v1001_v42, %v911_v34 }
 0x13c   : > { %v869_v3 = vpop.xlane.xlu0 %868 }
 0x13d   : > { %v871_v4 = vmul.f32 0.00390625, %v869_v3 }
 0x13f   : > { %v872_v5 = vsub.f32 %v863_v0, %v871_v4  ;;  %v873_v6 = vsub.f32 %v864_v1, %v871_v4 }
 0x141   : > { %v874_v7 = vmul.f32 %v872_v5, %v872_v5  ;;  %v875_v8 = vmul.f32 %v873_v6, %v873_v6 }
 0x143   : > { %v876_v9 = vadd.f32 %v875_v8, %v874_v7 }
 0x145   : > { %877 = vadd.xlane.f32.xlu0 %v876_v9 }
 0x1ce   : > { %v878_v11 = vpop.xlane.xlu0 %877 }
 0x1cf   : > { %v879_v12 = vmul.f32 0.00390625, %v878_v11 }
 0x1d1   : > { %v880_v13 = vadd.f32 1e-05, %v879_v12 }
 0x1d3   : > { %2221 = vrsqrt.f32 %v880_v13 }
 0x1e0   : > { %v2222_v28 = vpop.eup %2221 }
 0x1e1   : > { %v882_v37 = vmul.f32 %v2222_v28, %v872_v5  ;;  %v883_v38 = vmul.f32 %v2222_v28, %v873_v6 }
 0x1e3   : > { %v895_v45 = vmul.f32 %v888_v26, %v882_v37  ;;  %v896_v46 = vmul.f32 %v892_v27, %v883_v38 }
 0x1e5   : > { %v908_v53 = vadd.f32 %v901_v29, %v895_v45  ;;  %v909_v54 = vadd.f32 %v905_v30, %v896_v46 }
 0x1e7   : > { %915 = vst [vmem:[%s3088_s6] sm:$0xff] %v908_v53  ;;  %916 = vst [vmem:[%s3088_s6 + $0x8] sm:$0xff] %v909_v54  ;;  %v928_v57 = vmul.f32 %v921_v39, %v908_v53  ;;  %v929_v58 = vmul.f32 %v925_v40, %v909_v54  ;;  %v959_v59 = vmul.f32 %v952_v43, %v908_v53 }
 0x1e8   : > { %v960_v60 = vmul.f32 %v956_v44, %v909_v54  ;;  %v990_v61 = vmul.f32 %v983_v49, %v908_v53  ;;  %v991_v62 = vmul.f32 %v987_v50, %v909_v54 }
 0x1e9   : > { %v944_v63 = vadd.f32 %v942_v47, %v928_v57  ;;  %v945_v0 = vadd.f32 %v943_v48, %v929_v58  ;;  %v975_v1 = vadd.f32 %v973_v51, %v959_v59 }
 0x1ea   : > { %v976_v2 = vadd.f32 %v974_v52, %v960_v60  ;;  %v1006_v3 = vadd.f32 %v1004_v55, %v990_v61  ;;  %v1007_v4 = vadd.f32 %v1005_v56, %v991_v62 }
 0x1eb   : > { %946 = vst [vmem:[#allocation2] sm:$0xff] %v944_v63  ;;  %947 = vst [vmem:[#allocation2 + $0x8] sm:$0xff] %v945_v0 }
 0x1ec   : > { %977 = vst [vmem:[#allocation3 + $0x8] sm:$0xff] %v975_v1  ;;  %978 = vst [vmem:[#allocation3] sm:$0xff] %v976_v2 }
 0x1ed   : > { %1008 = vst [vmem:[#allocation4 + $0x8] sm:$0xff] %v1006_v3  ;;  %1009 = vst [vmem:[#allocation4] sm:$0xff] %v1007_v4 }
 0x1ee PF: > { %v2223_v5 = vld [vmem:[%s2780_s13 + $0x78] sm:$0xff]   ;;  %v2225_v7 = vld [vmem:[%s2780_s13 + $0x70] sm:$0xff]   ;;  %v2227_v9 = vld [vmem:[%s2780_s13 + $0x68] sm:$0xff]   ;;  %s3091_s14 = scalar_lea.vmem %s3014_s10, %s2803_s30  ;;  %s3094_s26 = scalar_lea.vmem %s3022_s18, %s2806_s27 }
 0x1ef   : > { %v2224_v6 = vld [vmem:[%s2780_s13 + $0x38] sm:$0xff]   ;;  %2095 = vmatprep.subr.bf16.mxu0 %v2223_v5  ;;  %v2226_v8 = vld [vmem:[%s2780_s13 + $0x30] sm:$0xff]   ;;  %v2228_v10 = vld [vmem:[%s2780_s13 + $0x28] sm:$0xff]   ;;  %p2090_p10 = scmp.ne.s32.totalorder %s2599_s2, 1 }
 0x1f0   : > { %2096 = vmatpush3.bf16.msra.mxu0 %v2224_v6  ;;  %v2229_v11 = vld [vmem:[%s2780_s13 + $0x60] sm:$0xff]   ;;  %v2234_v13 = vld [vmem:[%s2787_s23 + $0x78] sm:$0xff]   ;;  %v2238_v17 = vld [vmem:[%s2787_s23 + $0x70] sm:$0xff]   ;;  %s3097_s16 = sld [smem:[#allocation34_spill]] (!%p2090_p10) }
 0x1f1   : > { %2097 = vmatprep.subr.bf16.mxu0 %v2225_v7  ;;  %v2230_v12 = vld [vmem:[%s2780_s13 + $0x20] sm:$0xff]   ;;  %v2231_v14 = vld [vmem:[%s2780_s13 + $0x58] sm:$0xff]   ;;  %2117 = vmatprep.subr.bf16.mxu1 %v2234_v13  ;;  %v2233_v18 = vld [vmem:[%s2780_s13 + $0x50] sm:$0xff]  }
 0x1f2   : > { %v2236_v15 = vld [vmem:[%s2787_s23 + $0x38] sm:$0xff]   ;;  %v2240_v19 = vld [vmem:[%s2787_s23 + $0x30] sm:$0xff]   ;;  %v2242_v21 = vld [vmem:[%s2787_s23 + $0x68] sm:$0xff]  }
 0x1f3   : > { %v2232_v16 = vld [vmem:[%s2780_s13 + $0x18] sm:$0xff]   ;;  %2118 = vmatpush3.bf16.msra.mxu1 %v2236_v15  ;;  %v2235_v20 = vld [vmem:[%s2780_s13 + $0x10] sm:$0xff]   ;;  %v2237_v22 = vld [vmem:[%s2780_s13 + $0x48] sm:$0xff]  }
 0x1f4   : > { %2098 = vmatpush3.bf16.msra.mxu0 %v2226_v8  ;;  %2119 = vmatprep.subr.bf16.mxu1 %v2238_v17  ;;  %v2244_v23 = vld [vmem:[%s2787_s23 + $0x28] sm:$0xff]   ;;  %v2245_v27 = vld [vmem:[%s2787_s23 + $0x60] sm:$0xff]   ;;  %v2249_v32 = vld [vmem:[%s2787_s23 + $0x58] sm:$0xff]  }
 0x1f5   : > { %2099 = vmatprep.subr.bf16.mxu0 %v2227_v9  ;;  %v2239_v24 = vld [vmem:[%s2780_s13 + $0x8] sm:$0xff]   ;;  %v2241_v28 = vld [vmem:[%s2780_s13 + $0x40] sm:$0xff]   ;;  %v2246_v33 = vld [vmem:[%s2793_s1 + $0x78] sm:$0xff]  }
 0x1f6   : > { %v1013_v25 = vld [vmem:[#allocation2 + $0x8] sm:$0xff]  ;;  %v2243_v29 = vld [vmem:[%s2780_s13] sm:$0xff]   ;;  %v2251_v34 = vld [vmem:[%s2787_s23 + $0x18] sm:$0xff]   ;;  %s3095_s13 = scalar_lea.vmem %s3021_s17, %s2806_s27 }
 0x1f7   : > { %2120 = vmatpush3.bf16.msra.mxu1 %v2240_v19  ;;  %v1015_v26 = vpack.c.bf16 %v1013_v25, %v1013_v25  ;;  %v2247_v30 = vld [vmem:[%s2787_s23 + $0x20] sm:$0xff]   ;;  %v2248_v36 = vld [vmem:[%s2793_s1 + $0x38] sm:$0xff]   ;;  %v2253_v37 = vld [vmem:[%s2787_s23 + $0x50] sm:$0xff]  }
 0x1f8   : > { %2100 = vmatpush3.bf16.msra.mxu0 %v2228_v10  ;;  %2121 = vmatprep.subr.bf16.mxu1 %v2242_v21  ;;  %v1012_v31 = vld [vmem:[#allocation2] sm:$0xff]  ;;  %v2250_v38 = vld [vmem:[%s2793_s1 + $0x70] sm:$0xff]   ;;  %v2257_v41 = vld [vmem:[%s2787_s23 + $0x48] sm:$0xff]  }
 0x1f9   : > { %2101 = vmatprep.subr.bf16.mxu0 %v2229_v11  ;;  %1176 = vmatprep.mubr.bf16.mxu0 %v1015_v26  ;;  %v1014_v35 = vpack.c.bf16 %v1012_v31, %v1012_v31  ;;  %v2255_v39 = vld [vmem:[%s2787_s23 + $0x10] sm:$0xff]   ;;  %v2254_v42 = vld [vmem:[%s2793_s1 + $0x68] sm:$0xff]   ;;  %v2261_v45 = vld [vmem:[%s2787_s23 + $0x40] sm:$0xff]  }
 0x1fa   : > { %v2252_v40 = vld [vmem:[%s2793_s1 + $0x30] sm:$0xff]   ;;  %v2259_v43 = vld [vmem:[%s2787_s23 + $0x8] sm:$0xff]   ;;  %v2258_v46 = vld [vmem:[%s2793_s1 + $0x60] sm:$0xff]  }
 0x1fb   : > { %2122 = vmatpush3.bf16.msra.mxu1 %v2244_v23  ;;  %v2256_v44 = vld [vmem:[%s2793_s1 + $0x28] sm:$0xff]   ;;  %v2263_v47 = vld [vmem:[%s2787_s23] sm:$0xff]   ;;  %v1185_v49 = vld [vmem:[#allocation3] sm:$0xff]  ;;  %s3096_s23 = sld [smem:[#allocation20_spill]] (!%p2090_p10) }
 0x1fc   : > { %2102 = vmatpush3.bf16.msra.mxu0 %v2230_v12  ;;  %2123 = vmatprep.subr.bf16.mxu1 %v2245_v27  ;;  %v2260_v48 = vld [vmem:[%s2793_s1 + $0x20] sm:$0xff]   ;;  %v1187_v50 = vpack.c.bf16 %v1185_v49, %v1185_v49  ;;  %v1184_v51 = vld [vmem:[#allocation3 + $0x8] sm:$0xff]  ;;  %v2265_v55 = vld [vmem:[%s2793_s1 + $0x50] sm:$0xff]   ;;  %v2474_v12 = vmov 0  }
 0x1fd   : > { %2103 = vmatprep.subr.bf16.mxu0 %v2231_v14  ;;  %v2262_v52 = vld [vmem:[%s2793_s1 + $0x58] sm:$0xff]   ;;  %v1186_v53 = vpack.c.bf16 %v1184_v51, %v1184_v51  ;;  %v2266_v56 = vld [vmem:[%s2793_s1 + $0x10] sm:$0xff]   ;;  %v1357_v57 = vld [vmem:[#allocation4] sm:$0xff] }
 0x1fe   : > { %1348 = vmatprep.mubr.bf16.mxu1 %v1187_v50  ;;  %v2264_v54 = vld [vmem:[%s2793_s1 + $0x18] sm:$0xff]   ;;  %v2267_v58 = vld [vmem:[%s2793_s1 + $0x48] sm:$0xff]   ;;  %v1359_v59 = vpack.c.bf16 %v1357_v57, %v1357_v57  ;;  %v2269_v61 = vld [vmem:[%s2793_s1 + $0x40] sm:$0xff]  }
 0x1ff   : > { %2124 = vmatpush3.bf16.msra.mxu1 %v2247_v30  ;;  %v2268_v60 = vld [vmem:[%s2793_s1 + $0x8] sm:$0xff]   ;;  %v2270_v62 = vld [vmem:[%s2793_s1] sm:$0xff]   ;;  %v2273_v1 = vld [vmem:[%s2795_s21 + $0x74] ss:$8 sps:$4 sm:$0xff]  }
 0x200   : > { %2104 = vmatpush3.bf16.msra.mxu0 %v2232_v16  ;;  %2125 = vmatprep.subr.bf16.mxu1 %v2249_v32  ;;  %v1356_v63 = vld [vmem:[#allocation4 + $0x8] sm:$0xff]  ;;  %v2271_v2 = vld [vmem:[%s2795_s21 + $0x70] ss:$8 sps:$4 sm:$0xff]   ;;  %v2279_v5 = vld [vmem:[%s2795_s21 + $0x54] ss:$8 sps:$4 sm:$0xff]  }
 0x201   : > { %2105 = vmatprep.subr.bf16.mxu0 %v2233_v18  ;;  %v1358_v0 = vpack.c.bf16 %v1356_v63, %v1356_v63  ;;  %v2276_v3 = vld [vmem:[%s2795_s21 + $0x64] ss:$8 sps:$4 sm:$0xff]   ;;  %v2274_v4 = vld [vmem:[%s2795_s21 + $0x60] ss:$8 sps:$4 sm:$0xff]   ;;  %v2277_v6 = vld [vmem:[%s2795_s21 + $0x50] ss:$8 sps:$4 sm:$0xff]  }
 0x202   : > { %v2282_v7 = vld [vmem:[%s2795_s21 + $0x44] ss:$8 sps:$4 sm:$0xff]   ;;  %v2280_v8 = vld [vmem:[%s2795_s21 + $0x40] ss:$8 sps:$4 sm:$0xff]   ;;  %v2285_v9 = vld [vmem:[%s2795_s21 + $0x34] ss:$8 sps:$4 sm:$0xff]  }
 0x203   : > { %2126 = vmatpush3.bf16.msra.mxu1 %v2251_v34  ;;  %v2283_v10 = vld [vmem:[%s2795_s21 + $0x30] ss:$8 sps:$4 sm:$0xff]   ;;  %v2288_v11 = vld [vmem:[%s2795_s21 + $0x24] ss:$8 sps:$4 sm:$0xff]   ;;  %v2286_v13 = vld [vmem:[%s2795_s21 + $0x20] ss:$8 sps:$4 sm:$0xff]  }
 0x204   : > { %2106 = vmatpush3.bf16.msra.mxu0 %v2235_v20  ;;  %2127 = vmatprep.subr.bf16.mxu1 %v2253_v37  ;;  %v2291_v14 = vld [vmem:[%s2795_s21 + $0x14] ss:$8 sps:$4 sm:$0xff]   ;;  %v2289_v15 = vld [vmem:[%s2795_s21 + $0x10] ss:$8 sps:$4 sm:$0xff]   ;;  %v2294_v16 = vld [vmem:[%s2795_s21 + $0x4] ss:$8 sps:$4 sm:$0xff]  }
 0x205   : > { %2107 = vmatprep.subr.bf16.mxu0 %v2237_v22  ;;  %v2292_v17 = vld [vmem:[%s2795_s21] ss:$8 sps:$4 sm:$0xff]  }
 0x206   : > { %v1536_v18 = vld [vmem:[%s838_s4] sm:$0xff] }
 0x207   : > { %2128 = vmatpush3.bf16.msra.mxu1 %v2255_v39  ;;  %v2073_v19 = vld [vmem:[%s844_s12] ss:$0 sm:$0xff] }
 0x208   : > { %2108 = vmatpush3.bf16.msra.mxu0 %v2239_v24  ;;  %2129 = vmatprep.subr.bf16.mxu1 %v2257_v41  ;;  %v1564_v21 = vadd.f32 %v2073_v19, %v1536_v18  ;;  %v2072_v32 = vld [vmem:[%s3091_s14] ss:$0 sm:$0xff] }
 0x209   : > { %2109 = vmatprep.subr.bf16.mxu0 %v2241_v28 }
 0x20b   : > { %2130 = vmatpush3.bf16.msra.mxu1 %v2259_v43 }
 0x20c   : > { %2110 = vmatpush3.bf16.msra.mxu0 %v2243_v29  ;;  %2131 = vmatprep.subr.bf16.mxu1 %v2261_v45 }
 0x20d   : > { %2139 = vmatprep.subr.bf16.mxu0 %v2246_v33 }
 0x20f   : > { %1177 = vmatmul.mubr.bf16.vlgmr.msra.gmra.mxu0 %v1014_v35  ;;  %2132 = vmatpush3.bf16.msra.mxu1 %v2263_v47 }
 0x210   : > { %2140 = vmatpush3.bf16.msra.mxu0 %v2248_v36  ;;  %1520 = vmatprep.mubr.bf16.mxu0 %v1359_v59 }
 0x211   : > { %2141 = vmatprep.subr.bf16.mxu0 %v2250_v38  ;;  %1682 = vmatprep.subr.bf16.mxu1 %v2273_v1  ;;  %v1535_v38 = vld [vmem:[%s834_s7] sm:$0xff] }
 0x212   : > { %1349 = vmatmul.mubr.bf16.vlgmr.msra.gmra.mxu1 %v1186_v53 }
 0x213   : > { %1683 = vmatpush1.bf16.msra.mxu1 %v2271_v2  ;;  %1714 = vmatprep.mubr.bf16.mxu1 %v2474_v12 }
 0x214   : > { %2142 = vmatpush3.bf16.msra.mxu0 %v2252_v40  ;;  %1684 = vmatprep.subr.bf16.mxu1 %v2276_v3  ;;  %v1534_v40 = vld [vmem:[%s830_s29] sm:$0xff] }
 0x215   : > { %2143 = vmatprep.subr.bf16.mxu0 %v2254_v42 }
 0x217   : > { %1685 = vmatpush1.bf16.msra.mxu1 %v2274_v4 }
 0x218   : > { %2144 = vmatpush3.bf16.msra.mxu0 %v2256_v44  ;;  %1686 = vmatprep.subr.bf16.mxu1 %v2279_v5 }
 0x219   : > { %2145 = vmatprep.subr.bf16.mxu0 %v2258_v46 }
 0x21b   : > { %1687 = vmatpush1.bf16.msra.mxu1 %v2277_v6 }
 0x21c   : > { %2146 = vmatpush3.bf16.msra.mxu0 %v2260_v48  ;;  %1688 = vmatprep.subr.bf16.mxu1 %v2282_v7 }
 0x21d   : > { %2147 = vmatprep.subr.bf16.mxu0 %v2262_v52 }
 0x21f   : > { %1689 = vmatpush1.bf16.msra.mxu1 %v2280_v8  ;;  %v1583_v8 = vld [vmem:[#allocation5] sm:$0xff] }
 0x220   : > { %2148 = vmatpush3.bf16.msra.mxu0 %v2264_v54  ;;  %1690 = vmatprep.subr.bf16.mxu1 %v2285_v9 }
 0x221   : > { %2149 = vmatprep.subr.bf16.mxu0 %v2265_v55 }
 0x223   : > { %1691 = vmatpush1.bf16.msra.mxu1 %v2283_v10  ;;  %v1584_v10 = vld [vmem:[#allocation5 + $0x8] sm:$0xff] }
 0x224   : > { %2150 = vmatpush3.bf16.msra.mxu0 %v2266_v56  ;;  %1692 = vmatprep.subr.bf16.mxu1 %v2288_v11 }
 0x225   : > { %2151 = vmatprep.subr.bf16.mxu0 %v2267_v58 }
 0x227   : > { %1693 = vmatpush1.bf16.msra.mxu1 %v2286_v13 }
 0x228   : > { %2152 = vmatpush3.bf16.msra.mxu0 %v2268_v60  ;;  %1694 = vmatprep.subr.bf16.mxu1 %v2291_v14 }
 0x229   : > { %2153 = vmatprep.subr.bf16.mxu0 %v2269_v61 }
 0x22b   : > { %1695 = vmatpush1.bf16.msra.mxu1 %v2289_v15 }
 0x22c   : > { %2154 = vmatpush3.bf16.msra.mxu0 %v2270_v62  ;;  %1696 = vmatprep.subr.bf16.mxu1 %v2294_v16 }
 0x22f   : > { %1521 = vmatmul.mubr.bf16.vlgmr.msra.gmra.mxu0 %v1358_v0  ;;  %1697 = vmatpush1.bf16.msra.mxu1 %v2292_v17 }
 0x2cf   : > { %v2111_v20 = vpop.f32.mrf.mxu0 }
 0x2d1   : > { %v2112_v22 = vpop.f32.mrf.mxu0 }
 0x2d2   : > { %v2113_v23 = vadd.f32 %v2112_v22, %v2111_v20  ;;  %v2133_v31 = vpop.f32.mrf.mxu1 }
 0x2d3   : > { %v2114_v24 = vpop.f32.mrf.mxu0 }
 0x2d4   : > { %v1565_v25 = vmax.f32 %v1564_v21, %v2113_v23  ;;  %v2134_v33 = vpop.f32.mrf.mxu1  ;;  %v1545_v35 = vadd.f32 %v2113_v23, %v2072_v32 }
 0x2d5   : > { %v2115_v26 = vpop.f32.mrf.mxu0  ;;  %v2135_v39 = vadd.f32 %v2134_v33, %v2133_v31 }
 0x2d6   : > { %v1566_v27 = vsub.f32 %v1564_v21, %v1565_v25  ;;  %v1569_v28 = vsub.f32 %v2113_v23, %v1565_v25  ;;  %1579 = vst [vmem:[%s857_s9] sm:$0xff] %v1565_v25  ;;  %v2136_v34 = vpop.f32.mrf.mxu1  ;;  %v1546_v37 = vmax.f32 %v1536_v18, %v1545_v35 }
 0x2d8   : > { %v1567_v29 = vmul.f32 1.442695, %v1566_v27  ;;  %v1570_v30 = vmul.f32 1.442695, %v1569_v28  ;;  %v2137_v36 = vpop.f32.mrf.mxu1  ;;  %v1547_v43 = vsub.f32 %v1536_v18, %v1546_v37  ;;  %v1550_v50 = vsub.f32 %v1545_v35, %v1546_v37 }
 0x2da   : > { %2295 = vpow2.f32 %v1567_v29  ;;  %v1548_v49 = vmul.f32 1.442695, %v1547_v43  ;;  %v1551_v52 = vmul.f32 1.442695, %v1550_v50 }
 0x2db   : > { %2297 = vpow2.f32 %v1570_v30 }
 0x2dc   : > { %2299 = vpow2.f32 %v1548_v49 }
 0x2dd   : > { %2301 = vpow2.f32 %v1551_v52 }
 0x2e7   : > { %v2296_v41 = vpop.eup %2295 }
 0x2e8   : > { %v2298_v42 = vpop.eup %2297  ;;  %v1576_v44 = vmul.f32 %v2296_v41, %v1535_v38  ;;  %v1572_v45 = vmul.f32 %v2296_v41, %v1534_v40 }
 0x2e9   : > { %v1573_v46 = vmul.f32 %v2298_v42, %v2135_v39  ;;  %v2300_v58 = vpop.eup %2299 }
 0x2ea   : > { %v1577_v47 = vadd.f32 %v2298_v42, %v1576_v44  ;;  %v1556_v59 = vmul.f32 %v2300_v58, %v1535_v38  ;;  %v2302_v60 = vpop.eup %2301  ;;  %v1553_v0 = vmul.f32 %v2300_v58, %v1534_v40 }
 0x2eb   : > { %v1574_v48 = vadd.f32 %v1573_v46, %v1572_v45  ;;  %v1554_v1 = vmul.f32 %v2302_v60, %v2135_v39 }
 0x2ec   : > { %1578 = vst [vmem:[%s3094_s26] sm:$0xff] %v1577_v47  ;;  %v1557_v62 = vadd.f32 %v2302_v60, %v1556_v59 }
 0x2ed   : > { %1575 = vst [vmem:[%s3095_s13] sm:$0xff] %v1574_v48  ;;  %v1555_v2 = vadd.f32 %v1554_v1, %v1553_v0 }
 0x2ef   : > { %v2155_v51 = vpop.f32.mrf.mxu0 }
 0x2f1   : > { %v2156_v53 = vpop.f32.mrf.mxu0 }
 0x2f2   : > { %v2157_v54 = vadd.f32 %v2156_v53, %v2155_v51 }
 0x2f3   : > { %v2158_v55 = vpop.f32.mrf.mxu0 }
 0x2f4   : > { %v2071_v56 = vmul.f32 -1.442695, %v2157_v54 }
 0x2f5   : > { %v2159_v57 = vpop.f32.mrf.mxu0 }
 0x2f6   : > { %2303 = vpow2.f32 %v2071_v56 }
 0x303   : > { %v2304_v61 = vpop.eup %2303 }
 0x304   : > { %v1531_v63 = vadd.f32 1.0, %v2304_v61 }
 0x306   : > { %2305 = vrcp.f32 %v1531_v63 }
 0x307   : > { %2307 = vrcp.f32 %v1557_v62 }
 0x313   : > { %v2306_v3 = vpop.eup %2305 }
 0x314   : > { %v1580_v4 = vmul.f32 %v2306_v3, %v1555_v2  ;;  %v2308_v5 = vpop.eup %2307 }
 0x316   : > { %v1582_v6 = vmul.f32 %v2308_v5, %v1580_v4 }
 0x318   : > { %v1585_v7 = vpack.c.bf16 %v1582_v6, %v1582_v6 }
 0x31a   : > { %1715 = vmatmul.mubr.bf16.vlgmr.msra.gmra.mxu1 %v1585_v7 }
 0x3da   : > { %v1716_v9 = vpop.f32.mrf.mxu1 }
 0x3db   : > { %v1723_v11 = vadd.f32 %v1716_v9, %v1583_v8 }
 0x3dc   : > { %v1718_v12 = vpop.f32.mrf.mxu1  ;;  %1730 = sbr.rel (%p2090_p10) target bundleno = 1002 (0x3ea), region = 108 }
 0x3dd   : > { %1725 = vst [vmem:[#allocation5] sm:$0xff] %v1723_v11  ;;  %v1724_v13 = vadd.f32 %v1718_v12, %v1584_v10 }
 0x3de   : > { %v1720_v14 = vpop.f32.mrf.mxu1 }
 0x3df   : > { %1726 = vst [vmem:[#allocation5 + $0x8] sm:$0xff] %v1724_v13 }
 0x3e0   : > { %v1721_v15 = vpop.f32.mrf.mxu1 }
 0x3e1   : > { %v1731_v16 = vld [vmem:[%s3096_s23] sm:$0xff]  ;;  %v1732_v18 = vld [vmem:[%s3096_s23 + $0x8] sm:$0xff] }
 0x3e4   : > { %v1733_v17 = vld [vmem:[#allocation5] sm:$0xff] }
 0x3e5   : > { %v1735_v19 = vadd.f32 %v1733_v17, %v1731_v16 }
 0x3e6   : > { %v1734_v20 = vld [vmem:[#allocation5 + $0x8] sm:$0xff] }
 0x3e7   : > { %v1736_v21 = vadd.f32 %v1734_v20, %v1732_v18  ;;  %1737 = vst [vmem:[%s3097_s16] sm:$0xff] %v1735_v19 }
 0x3e9   : > { %1738 = vst [vmem:[%s3097_s16 + $0x8] sm:$0xff] %v1736_v21 }
 0x3ea PF: > { %s3098_s24 = sld [smem:[#allocation18_spill]] }
 0x3eb   : > { %s3099_s1 = sld [smem:[#allocation16_spill]] }
 0x3ec   : > { %s3100_s22 = sld [smem:[#allocation17_spill]] }
 0x3ed   : > { %s3101_s23 = sld [smem:[#allocation19_spill]] }
 0x3f0   : > { %p37_p12 = scmp.ge.s32.totalorder %s3098_s24, 4  }
 0x3f2   :  { %39 = sbr.rel (!%p37_p12) target bundleno = 25 (0x19), region = 224 }
 0x3f7   :  { %1798 = vsyncpa [#allocation7], 1 }
 0x3f8   :  { %1800 = vsyncpa [#allocation7 + $0x1], 1 }
 0x3f9   :  { %1801 = vsyncpa [#allocation9], 1 }
 0x3fa   :  { %1803 = vsyncpa [#allocation9 + $0x1], 1 }
 0x3fb   :  { %1804 = vsyncpa [#allocation12], 1 }
 0x3fc   :  { %1806 = vsyncpa [#allocation12 + $0x1], 1 }

// kernel: block_script.3
= control target key start
LH: loop header
LB: loop body
LE: loop exit
PB: predicated region body
PF: predicated region fallthrough
CT: control target
= control target key end

     0   :  { %16 = vsyncpa [#allocation8], 0  ;;  %s2221_s0 = inlined_call_operand.vmem [shape: f32[8,256], index: 0, kind: input, shape index: {}]   ;;  %s2222_s1 = inlined_call_operand.vmem [shape: f32[8,256], index: 1, kind: input, shape index: {}, may-alias: {1,10}]   ;;  %s2223_s2 = inlined_call_operand.vmem [shape: f32[1,256], index: 2, kind: input, shape index: {}]   ;;  %s2224_s3 = inlined_call_operand.vmem [shape: f32[1,256], index: 3, kind: input, shape index: {}]   ;;  %s2225_s4 = inlined_call_operand.vmem [shape: f32[1,256], index: 4, kind: input, shape index: {}]   ;;  %s2226_s5 = inlined_call_operand.vmem [shape: f32[1,256], index: 5, kind: input, shape index: {}]   ;;  %s2227_s6 = inlined_call_operand.vmem [shape: bf16[256,512], index: 6, kind: input, shape index: {}]   ;;  %s2228_s7 = inlined_call_operand.hbm [shape: bf16[256,256], index: 7, kind: input, shape index: {}]   ;;  %s2229_s8 = inlined_call_operand.vmem [shape: bf16[512,256], index: 8, kind: input, shape index: {}]   ;;  %s2230_s9 = inlined_call_operand.hbm [shape: f32[8,256], index: 9, kind: output, shape index: {0}]   ;;  %s2231_s10 = inlined_call_operand.vmem [shape: f32[8,256], index: 10, kind: output, shape index: {1}, may-alias: {1,10}]  }
   0x1   :  { %18 = vsyncpa [#allocation8 + $0x1], 0 }
   0x2   :  { %19 = vsyncpa [#allocation9], 0  ;;  %s1909_s13 = smov 0   ;;  %s1911_s14 = smov 0  }
   0x3   :  { %s1913_s15 = smov 0   ;;  %s1915_s16 = smov 0  }
   0x4 LB: > { %s1928_s17 = sadd.s32 4294967295, %s1846_s16   ;;  %s1931_s18 = sadd.s32 1, %s1846_s16   ;;  %s1846_s16 = sphi %s1915_s16, %s2237_s16   ;;  %s1842_s15 = sphi %s1913_s15, %s2236_s15   ;;  %s1838_s14 = sphi %s1911_s14, %s2235_s14   ;;  %s1834_s13 = sphi %s1909_s13, %s2234_s13  }
   0x5   : > { %s155_s19 = ssub.s32 %s1846_s16, %s1931_s18  ;;  %s158_s20 = sadd.s32 1, %s1842_s15 }
   0x6   : > { %p156_p0 = scmp.eq.s32.totalorder %s155_s19, 0  ;;  %p165_p1 = scmp.ne.s32.totalorder %s1842_s15, %s1838_s14 }
   0x7   : > { %p166_p2 = scmp.eq.s32.totalorder %s1846_s16, 0  ;;  %p197_p3 = scmp.ne.s32.totalorder %s1838_s14, %s1834_s13 }
   0x8   : > { %s1941_s21 = scalar_select %p156_p0, %s1842_s15, %s158_s20  }
   0x9   : > { %p1943_p4 = por %p166_p2, %p165_p1  ;;  %p198_p5 = scmp.eq.s32.totalorder %s1928_s17, 0 }
   0xa   : > { %p1470_p7 = scmp.ge.s32.totalorder %s1846_s16, 2 }
   0xb   : > { %p1948_p6 = por %p198_p5, %p197_p3 }
   0xc   : > { %303 = sbr.rel (%p1470_p7) target bundleno = 63 (0x3f), region = 40 }
  0x11   : > { %306 = sbr.rel (!%p1943_p4) target bundleno = 37 (0x25), region = 44  ;;  %s308_s24 = sand.u32 (%p1943_p4), 1, %s1842_s15  }
  0x12   : > { %s1571_s25 = sshll.u32 (%p1943_p4), %s1846_s16, 3  ;;  %s1471_s26 = sshll.u32 (%p1943_p4), %s308_s24, 8 }
  0x13   : > { %s1960_s29 = scalar_lea.vmem (%p1943_p4), %s2227_s6, %s1571_s25  ;;  %s1965_s30 = scalar_lea.vmem (%p1943_p4), [#allocation6], %s1471_s26 }
  0x14   : > { %v404_v0 = vld [vmem:[%s1960_s29] sm:$0xff] (%p1943_p4)  ;;  %v406_v1 = vld [vmem:[%s1960_s29 + $0x10] sm:$0xff] (%p1943_p4) }
  0x15   : > { %v408_v2 = vld [vmem:[%s1960_s29 + $0x20] sm:$0xff] (%p1943_p4)  ;;  %405 = vst [vmem:[%s1965_s30] sm:$0xff] (%p1943_p4), %v404_v0  ;;  %407 = vst [vmem:[%s1965_s30 + $0x8] sm:$0xff] (%p1943_p4), %v406_v1  ;;  %v410_v3 = vld [vmem:[%s1960_s29 + $0x30] sm:$0xff] (%p1943_p4) }
  0x16   : > { %409 = vst [vmem:[%s1965_s30 + $0x10] sm:$0xff] %v408_v2  ;;  %v412_v4 = vld [vmem:[%s1960_s29 + $0x40] sm:$0xff]  ;;  %v414_v5 = vld [vmem:[%s1960_s29 + $0x50] sm:$0xff]  ;;  %411 = vst [vmem:[%s1965_s30 + $0x18] sm:$0xff] %v410_v3 }
  0x17   : > { %413 = vst [vmem:[%s1965_s30 + $0x20] sm:$0xff] %v412_v4  ;;  %415 = vst [vmem:[%s1965_s30 + $0x28] sm:$0xff] %v414_v5  ;;  %v416_v6 = vld [vmem:[%s1960_s29 + $0x60] sm:$0xff]  ;;  %v418_v7 = vld [vmem:[%s1960_s29 + $0x70] sm:$0xff] }
  0x18   : > { %v420_v8 = vld [vmem:[%s1960_s29 + $0x80] sm:$0xff]  ;;  %417 = vst [vmem:[%s1965_s30 + $0x30] sm:$0xff] %v416_v6  ;;  %419 = vst [vmem:[%s1965_s30 + $0x38] sm:$0xff] %v418_v7  ;;  %v422_v9 = vld [vmem:[%s1960_s29 + $0x90] sm:$0xff] }
  0x19   : > { %421 = vst [vmem:[%s1965_s30 + $0x40] sm:$0xff] %v420_v8  ;;  %v424_v10 = vld [vmem:[%s1960_s29 + $0xa0] sm:$0xff]  ;;  %v426_v11 = vld [vmem:[%s1960_s29 + $0xb0] sm:$0xff]  ;;  %423 = vst [vmem:[%s1965_s30 + $0x48] sm:$0xff] %v422_v9 }
  0x1a   : > { %425 = vst [vmem:[%s1965_s30 + $0x50] sm:$0xff] %v424_v10  ;;  %427 = vst [vmem:[%s1965_s30 + $0x58] sm:$0xff] %v426_v11  ;;  %v428_v12 = vld [vmem:[%s1960_s29 + $0xc0] sm:$0xff]  ;;  %v430_v13 = vld [vmem:[%s1960_s29 + $0xd0] sm:$0xff] }
  0x1b   : > { %v432_v14 = vld [vmem:[%s1960_s29 + $0xe0] sm:$0xff]  ;;  %429 = vst [vmem:[%s1965_s30 + $0x60] sm:$0xff] %v428_v12  ;;  %431 = vst [vmem:[%s1965_s30 + $0x68] sm:$0xff] %v430_v13  ;;  %v434_v15 = vld [vmem:[%s1960_s29 + $0xf0] sm:$0xff] }
  0x1c   : > { %433 = vst [vmem:[%s1965_s30 + $0x70] sm:$0xff] %v432_v14  ;;  %v436_v16 = vld [vmem:[%s1960_s29 + $0x100] sm:$0xff]  ;;  %v438_v17 = vld [vmem:[%s1960_s29 + $0x110] sm:$0xff]  ;;  %435 = vst [vmem:[%s1965_s30 + $0x78] sm:$0xff] %v434_v15 }
  0x1d   : > { %437 = vst [vmem:[%s1965_s30 + $0x80] sm:$0xff] %v436_v16  ;;  %439 = vst [vmem:[%s1965_s30 + $0x88] sm:$0xff] %v438_v17  ;;  %v440_v18 = vld [vmem:[%s1960_s29 + $0x120] sm:$0xff]  ;;  %v442_v19 = vld [vmem:[%s1960_s29 + $0x130] sm:$0xff] }
  0x1e   : > { %v444_v20 = vld [vmem:[%s1960_s29 + $0x140] sm:$0xff]  ;;  %441 = vst [vmem:[%s1965_s30 + $0x90] sm:$0xff] %v440_v18  ;;  %443 = vst [vmem:[%s1965_s30 + $0x98] sm:$0xff] %v442_v19  ;;  %v446_v21 = vld [vmem:[%s1960_s29 + $0x150] sm:$0xff] }
  0x1f   : > { %445 = vst [vmem:[%s1965_s30 + $0xa0] sm:$0xff] %v444_v20  ;;  %v448_v22 = vld [vmem:[%s1960_s29 + $0x160] sm:$0xff]  ;;  %v450_v23 = vld [vmem:[%s1960_s29 + $0x170] sm:$0xff]  ;;  %447 = vst [vmem:[%s1965_s30 + $0xa8] sm:$0xff] %v446_v21 }
  0x20   : > { %449 = vst [vmem:[%s1965_s30 + $0xb0] sm:$0xff] %v448_v22  ;;  %451 = vst [vmem:[%s1965_s30 + $0xb8] sm:$0xff] %v450_v23  ;;  %v452_v24 = vld [vmem:[%s1960_s29 + $0x180] sm:$0xff]  ;;  %v454_v25 = vld [vmem:[%s1960_s29 + $0x190] sm:$0xff] }
  0x21   : > { %v456_v26 = vld [vmem:[%s1960_s29 + $0x1a0] sm:$0xff]  ;;  %453 = vst [vmem:[%s1965_s30 + $0xc0] sm:$0xff] %v452_v24  ;;  %455 = vst [vmem:[%s1965_s30 + $0xc8] sm:$0xff] %v454_v25  ;;  %v458_v27 = vld [vmem:[%s1960_s29 + $0x1b0] sm:$0xff] }
  0x22   : > { %457 = vst [vmem:[%s1965_s30 + $0xd0] sm:$0xff] %v456_v26  ;;  %v460_v28 = vld [vmem:[%s1960_s29 + $0x1c0] sm:$0xff]  ;;  %v462_v29 = vld [vmem:[%s1960_s29 + $0x1d0] sm:$0xff]  ;;  %459 = vst [vmem:[%s1965_s30 + $0xd8] sm:$0xff] %v458_v27 }
  0x23   : > { %461 = vst [vmem:[%s1965_s30 + $0xe0] sm:$0xff] %v460_v28  ;;  %463 = vst [vmem:[%s1965_s30 + $0xe8] sm:$0xff] %v462_v29  ;;  %v464_v30 = vld [vmem:[%s1960_s29 + $0x1e0] sm:$0xff]  ;;  %v466_v31 = vld [vmem:[%s1960_s29 + $0x1f0] sm:$0xff] }
  0x24   : > { %465 = vst [vmem:[%s1965_s30 + $0xf0] sm:$0xff] %v464_v30  ;;  %467 = vst [vmem:[%s1965_s30 + $0xf8] sm:$0xff] %v466_v31 }
  0x25 PF: > { %s474_s11 = sand.u32 1, %s1842_s15   ;;  %s1475_s12 = sshll.u32 %s1846_s16, 6 }
  0x26   : > { %s1474_s13 = sshll.u32 %s474_s11, 7  ;;  %s2033_s24 = scalar_lea.hbm %s2228_s7, %s1475_s12 }
  0x27   : > { %s478_s25 = scalar_lea.vmem [#allocation7], %s1474_s13  ;;  %s2037_s27 = scalar_lea.sflag [#allocation8], %s474_s11 }
  0x28   : > { %s484_s26 = sshll.u32 %s478_s25, 4  ;;  %s1758_s28 = scalar_lea.hbm %s2033_s24, 2048  ;;  %s2035_s26 = int_to_ptr.vmem [resolvable:$true] %s484_s26 }
  0x29   : > { %p1759_p8 = scmp.ne.s32.totalorder %s2033_s24, %s1758_s28  ;;  %s1762_s19 = scalar_lea.hbm %s2228_s7, 4096 }
  0x2a   : > { %p1763_p11 = scmp.lt.s32.totalorder %s2033_s24, %s2228_s7  ;;  %p1764_p12 = scmp.lt.s32.totalorder %s1762_s19, %s1758_s28 }
  0x2b   : > { %p1760_p9 = pnand %p1759_p8, %p1943_p4 }
  0x2c   : > { %p1765_p13 = por %p1764_p12, %p1763_p11 }
  0x2d   : > { %p1761_p10 = pneg %p1760_p9 }
  0x2f   : > { %p1766_p0 = pnand %p1765_p13, %p1761_p10 }
  0x31   : > { %1769 = shalt.err (!%p1766_p0)
}
  0x32   : > { %s1770_s11 = scalar_lea.vmem %s2035_s26, 2048  ;;  %s1848_s13 = smov [#allocation7]  }
  0x33   : > { %p1771_p1 = scmp.ne.s32.totalorder %s2035_s26, %s1770_s11  ;;  %s1774_s25 = sshll.u32 %s1848_s13, 4  ;;  %s1775_s25 = int_to_ptr.vmem [resolvable:$false] %s1774_s25 }
  0x34   : > { %s1776_s29 = scalar_lea.vmem %s1775_s25, 4096  ;;  %p1777_p5 = scmp.lt.s32.totalorder %s2035_s26, %s1775_s25 }
  0x35   : > { %p1772_p2 = pnand %p1771_p1, %p1943_p4  ;;  %p1778_p7 = scmp.lt.s32.totalorder %s1776_s29, %s1770_s11 }
  0x37   : > { %p1773_p3 = pneg %p1772_p2  ;;  %p1779_p8 = por %p1778_p7, %p1777_p5 }
  0x39   : > { %p1780_p9 = pnand %p1779_p8, %p1773_p3 }
  0x3b   : > { %1783 = shalt.err (!%p1780_p9)
}
  0x3c   : > { %s1849_s28 = smov 128   ;;  %s1850_s30 = smov 64  }
  0x3d   : > { %s1851_s19 = smov 4  }
  0x3e   : > { %1595 = dma.hbm_to_vmem [thread:$0]  (%p1943_p4), %s2033_s24, 2048, %s2035_s26, %s2037_s27, %s1849_s28, %s1850_s30, %s1851_s19  }
  0x3f PF: > { %p1476_p10 = scmp.ge.s32.totalorder %s1846_s16, 1  ;;  %p502_p11 = scmp.lt.s32.totalorder %s1846_s16, 3 }
  0x41   : > { %p503_p12 = pnand %p1476_p10, %p502_p11 }
  0x42   : > { %s509_s12 = sand.u32 (!%p503_p12), 1, %s1838_s14  }
  0x43   : > { %506 = sbr.rel (%p503_p12) target bundleno = 889 (0x379), region = 90  ;;  %s1477_s20 = sshll.u32 (!%p503_p12), %s509_s12, 8 }
  0x44   : > { %s1478_s11 = sshll.u32 (!%p503_p12), %s509_s12, 7  ;;  %s2063_s13 = scalar_lea.vmem (!%p503_p12), [#allocation6], %s1477_s20 }
  0x45   : > { %s516_s25 = scalar_lea.sflag (!%p503_p12), [#allocation8], %s509_s12  ;;  %s2065_s29 = scalar_lea.vmem (!%p503_p12), [#allocation7], %s1478_s11 }
  0x48   : > { %1825 = dma.done.wait (%p1948_p6), %s516_s25, 2048  }
  0x49   : > { %1827 = vsyncadd (%p1948_p6), %s516_s25, 4294965248  ;;  %s1479_s22 = sshll.u32 %s1928_s17, 5  ;;  %p1482_p13 = scmp.ne.s32.totalorder %s1928_s17, 0 }
  0x4a   : > { %p563_p4 = scmp.lt.s32.totalorder %s1479_s22, 63 }
  0x4b   : > { %573 = sbr.rel (%p1482_p13) target bundleno = 397 (0x18d), region = 102 }
  0x4c   : > { %s2239_s22 = smov (!%p563_p4, %s1479_s22), 63 }
  0x4d   : > { %s1572_s16 = sshll.u32 %s2239_s22, 3 }
  0x4e   : > { %s2075_s27 = scalar_lea.vmem %s2229_s8, %s1572_s16 }
  0x50   : > { %v574_v32 = vld [vmem:[%s2221_s0] sm:$0xff]  ;;  %v575_v33 = vld [vmem:[%s2221_s0 + $0x8] sm:$0xff]  ;;  %v1852_v42 = vmov 0.0   ;;  %v596_v46 = vlaneseq }
  0x51   : > { %v578_v34 = vadd.f32 %v575_v33, %v574_v32  ;;  %689 = vst [vmem:[#allocation5 + $0x8] sm:$0xff] %v1852_v42  ;;  %690 = vst [vmem:[#allocation5] sm:$0xff] %v1852_v42  ;;  %v623_v48 = vld [vmem:[%s2225_s4] sm:$0x3]  ;;  %v622_v0 = vld [vmem:[%s2222_s1 + $0x8] sm:$0xff] }
  0x52   : > { %v597_v47 = vshrl.u32 %v596_v46, 7  ;;  %v624_v49 = vld [vmem:[%s2226_s5] sm:$0x3]  ;;  %v640_v53 = vsub.f32 1.0, %v623_v48 }
  0x53   : > { %579 = vadd.xlane.f32.xlu0 %v578_v34  ;;  %v576_v52 = vld [vmem:[%s2223_s2] sm:$0x3]  ;;  %v671_v55 = vsub.f32 1.0, %v624_v49 }
  0x54   : > { %v598_v50 = vsub.s32 0, %v597_v47  ;;  %v602_v51 = vsub.s32 1, %v597_v47  ;;  %v577_v54 = vld [vmem:[%s2224_s3] sm:$0x3] }
  0x55   : > { %v621_v63 = vld [vmem:[%s2222_s1] sm:$0xff] }
  0x56   : > { %v599_v56 = vrot.slane %v576_v52, %v598_v50  ;;  %v603_v57 = vrot.slane %v576_v52, %v602_v51  ;;  %v612_v59 = vrot.slane %v577_v54, %v598_v50  ;;  %v616_v60 = vrot.slane %v577_v54, %v602_v51 }
  0x57   : > { %v645_v61 = vrot.slane %v640_v53, %v598_v50  ;;  %v649_v62 = vrot.slane %v640_v53, %v602_v51  ;;  %v676_v1 = vrot.slane %v671_v55, %v598_v50  ;;  %v680_v2 = vrot.slane %v671_v55, %v602_v51 }
  0x58   : > { %v631_v5 = vrot.slane %v623_v48, %v598_v50  ;;  %v635_v6 = vrot.slane %v623_v48, %v602_v51  ;;  %v662_v7 = vrot.slane %v624_v49, %v598_v50  ;;  %v666_v8 = vrot.slane %v624_v49, %v602_v51 }
  0x59   : > { %v652_v11 = vmul.f32 %v645_v61, %v621_v63  ;;  %v653_v12 = vmul.f32 %v649_v62, %v622_v0  ;;  %v683_v13 = vmul.f32 %v676_v1, %v621_v63  ;;  %v684_v14 = vmul.f32 %v680_v2, %v622_v0 }
  0xdc   : > { %v580_v35 = vpop.xlane.xlu0 %579 }
  0xdd   : > { %v582_v36 = vmul.f32 0.00390625, %v580_v35 }
  0xdf   : > { %v583_v37 = vsub.f32 %v574_v32, %v582_v36  ;;  %v584_v38 = vsub.f32 %v575_v33, %v582_v36 }
  0xe1   : > { %v585_v39 = vmul.f32 %v583_v37, %v583_v37  ;;  %v586_v40 = vmul.f32 %v584_v38, %v584_v38 }
  0xe3   : > { %v587_v41 = vadd.f32 %v586_v40, %v585_v39 }
  0xe5   : > { %588 = vadd.xlane.f32.xlu0 %v587_v41 }
 0x16e   : > { %v589_v43 = vpop.xlane.xlu0 %588 }
 0x16f   : > { %v590_v44 = vmul.f32 0.00390625, %v589_v43 }
 0x171   : > { %v591_v45 = vadd.f32 1e-05, %v590_v44 }
 0x173   : > { %1640 = vrsqrt.f32 %v591_v45 }
 0x180   : > { %v1641_v58 = vpop.eup %1640 }
 0x181   : > { %v593_v3 = vmul.f32 %v1641_v58, %v583_v37  ;;  %v594_v4 = vmul.f32 %v1641_v58, %v584_v38 }
 0x183   : > { %v606_v9 = vmul.f32 %v599_v56, %v593_v3  ;;  %v607_v10 = vmul.f32 %v603_v57, %v594_v4 }
 0x185   : > { %v619_v15 = vadd.f32 %v612_v59, %v606_v9  ;;  %v620_v16 = vadd.f32 %v616_v60, %v607_v10 }
 0x187   : > { %625 = vst [vmem:[%s2231_s10] sm:$0xff] %v619_v15  ;;  %626 = vst [vmem:[%s2231_s10 + $0x8] sm:$0xff] %v620_v16  ;;  %v638_v17 = vmul.f32 %v631_v5, %v619_v15  ;;  %v639_v18 = vmul.f32 %v635_v6, %v620_v16  ;;  %v669_v19 = vmul.f32 %v662_v7, %v619_v15 }
 0x188   : > { %v670_v20 = vmul.f32 %v666_v8, %v620_v16 }
 0x189   : > { %v654_v21 = vadd.f32 %v652_v11, %v638_v17  ;;  %v655_v22 = vadd.f32 %v653_v12, %v639_v18  ;;  %v685_v23 = vadd.f32 %v683_v13, %v669_v19 }
 0x18a   : > { %v686_v24 = vadd.f32 %v684_v14, %v670_v20 }
 0x18b   : > { %656 = vst [vmem:[#allocation2] sm:$0xff] %v654_v21  ;;  %657 = vst [vmem:[#allocation2 + $0x8] sm:$0xff] %v655_v22 }
 0x18c   : > { %687 = vst [vmem:[#allocation3 + $0x8] sm:$0xff] %v685_v23  ;;  %688 = vst [vmem:[#allocation3] sm:$0xff] %v686_v24 }
 0x18d PF: > { %v1642_v25 = vld [vmem:[%s2063_s13 + $0x74] ss:$8 sps:$4 sm:$0xff]   ;;  %v1644_v26 = vld [vmem:[%s2063_s13 + $0x70] ss:$8 sps:$4 sm:$0xff]   ;;  %v1645_v27 = vld [vmem:[%s2063_s13 + $0x64] ss:$8 sps:$4 sm:$0xff]  }
 0x18e   : > { %887 = vmatprep.subr.bf16.mxu0 %v1642_v25  ;;  %v1647_v28 = vld [vmem:[%s2063_s13 + $0x60] ss:$8 sps:$4 sm:$0xff]   ;;  %v1648_v29 = vld [vmem:[%s2063_s13 + $0x54] ss:$8 sps:$4 sm:$0xff]   ;;  %v1650_v30 = vld [vmem:[%s2063_s13 + $0x50] ss:$8 sps:$4 sm:$0xff]  }
 0x18f   : > { %888 = vmatpush1.bf16.msra.mxu0 %v1644_v26  ;;  %v1651_v31 = vld [vmem:[%s2063_s13 + $0x44] ss:$8 sps:$4 sm:$0xff]   ;;  %v1653_v32 = vld [vmem:[%s2063_s13 + $0x40] ss:$8 sps:$4 sm:$0xff]   ;;  %v1654_v33 = vld [vmem:[%s2063_s13 + $0x34] ss:$8 sps:$4 sm:$0xff]  }
 0x190   : > { %889 = vmatprep.subr.bf16.mxu0 %v1645_v27  ;;  %v1656_v34 = vld [vmem:[%s2063_s13 + $0x30] ss:$8 sps:$4 sm:$0xff]   ;;  %v1657_v35 = vld [vmem:[%s2063_s13 + $0x24] ss:$8 sps:$4 sm:$0xff]   ;;  %v1659_v36 = vld [vmem:[%s2063_s13 + $0x20] ss:$8 sps:$4 sm:$0xff]  }
 0x191   : > { %v1660_v37 = vld [vmem:[%s2063_s13 + $0x14] ss:$8 sps:$4 sm:$0xff]   ;;  %v1662_v40 = vld [vmem:[%s2063_s13 + $0x10] ss:$8 sps:$4 sm:$0xff]   ;;  %v1663_v41 = vld [vmem:[%s2063_s13 + $0x4] ss:$8 sps:$4 sm:$0xff]  }
 0x192   : > { %v692_v38 = vld [vmem:[#allocation2 + $0x8] sm:$0xff]  ;;  %v1693_v42 = vld [vmem:[%s2075_s27 + $0x74] ss:$8 sps:$4 sm:$0xff]   ;;  %v1696_v44 = vld [vmem:[%s2075_s27 + $0x70] ss:$8 sps:$4 sm:$0xff]   ;;  %p1566_p6 = scmp.ne.s32.totalorder %s1928_s17, 1 }
 0x193   : > { %890 = vmatpush1.bf16.msra.mxu0 %v1647_v28  ;;  %v694_v39 = vpack.c.bf16 %v692_v38, %v692_v38  ;;  %v1665_v43 = vld [vmem:[%s2063_s13] ss:$8 sps:$4 sm:$0xff]   ;;  %1128 = vmatprep.subr.bf16.mxu1 %v1693_v42  ;;  %v1666_v45 = vld [vmem:[%s2063_s13 + $0xf4] ss:$8 sps:$4 sm:$0xff]   ;;  %v1698_v46 = vld [vmem:[%s2075_s27 + $0x64] ss:$8 sps:$4 sm:$0xff]  }
 0x194   : > { %891 = vmatprep.subr.bf16.mxu0 %v1648_v29  ;;  %1129 = vmatpush1.bf16.msra.mxu1 %v1696_v44  ;;  %v1668_v47 = vld [vmem:[%s2063_s13 + $0xf0] ss:$8 sps:$4 sm:$0xff]   ;;  %v1701_v48 = vld [vmem:[%s2075_s27 + $0x60] ss:$8 sps:$4 sm:$0xff]   ;;  %v1669_v49 = vld [vmem:[%s2063_s13 + $0xe4] ss:$8 sps:$4 sm:$0xff]  }
 0x195   : > { %919 = vmatprep.mubr.bf16.mxu0 %v694_v39  ;;  %1130 = vmatprep.subr.bf16.mxu1 %v1698_v46  ;;  %v1703_v50 = vld [vmem:[%s2075_s27 + $0x54] ss:$8 sps:$4 sm:$0xff]   ;;  %v1706_v51 = vld [vmem:[%s2075_s27 + $0x50] ss:$8 sps:$4 sm:$0xff]   ;;  %v1671_v52 = vld [vmem:[%s2063_s13 + $0xe0] ss:$8 sps:$4 sm:$0xff]  }
 0x196   : > { %v1708_v53 = vld [vmem:[%s2075_s27 + $0x44] ss:$8 sps:$4 sm:$0xff]   ;;  %v1672_v54 = vld [vmem:[%s2063_s13 + $0xd4] ss:$8 sps:$4 sm:$0xff]   ;;  %v1711_v55 = vld [vmem:[%s2075_s27 + $0x40] ss:$8 sps:$4 sm:$0xff]  }
 0x197   : > { %892 = vmatpush1.bf16.msra.mxu0 %v1650_v30  ;;  %v1674_v56 = vld [vmem:[%s2063_s13 + $0xd0] ss:$8 sps:$4 sm:$0xff]   ;;  %v1713_v57 = vld [vmem:[%s2075_s27 + $0x34] ss:$8 sps:$4 sm:$0xff]   ;;  %v1675_v58 = vld [vmem:[%s2063_s13 + $0xc4] ss:$8 sps:$4 sm:$0xff]  }
 0x198   : > { %893 = vmatprep.subr.bf16.mxu0 %v1651_v31  ;;  %1131 = vmatpush1.bf16.msra.mxu1 %v1701_v48  ;;  %v1716_v59 = vld [vmem:[%s2075_s27 + $0x30] ss:$8 sps:$4 sm:$0xff]   ;;  %v1718_v60 = vld [vmem:[%s2075_s27 + $0x24] ss:$8 sps:$4 sm:$0xff]   ;;  %v1677_v61 = vld [vmem:[%s2063_s13 + $0xc0] ss:$8 sps:$4 sm:$0xff]  }
 0x199   : > { %1132 = vmatprep.subr.bf16.mxu1 %v1703_v50  ;;  %v1678_v62 = vld [vmem:[%s2063_s13 + $0xb4] ss:$8 sps:$4 sm:$0xff]   ;;  %v1721_v63 = vld [vmem:[%s2075_s27 + $0x20] ss:$8 sps:$4 sm:$0xff]   ;;  %v1680_v1 = vld [vmem:[%s2063_s13 + $0xb0] ss:$8 sps:$4 sm:$0xff]  }
 0x19a   : > { %v1723_v0 = vld [vmem:[%s2075_s27 + $0x14] ss:$8 sps:$4 sm:$0xff]   ;;  %v1681_v2 = vld [vmem:[%s2063_s13 + $0xa4] ss:$8 sps:$4 sm:$0xff]   ;;  %v1726_v3 = vld [vmem:[%s2075_s27 + $0x10] ss:$8 sps:$4 sm:$0xff]  }
 0x19b   : > { %894 = vmatpush1.bf16.msra.mxu0 %v1653_v32  ;;  %v1727_v4 = vld [vmem:[%s2075_s27 + $0x4] ss:$8 sps:$4 sm:$0xff]   ;;  %v1683_v5 = vld [vmem:[%s2063_s13 + $0xa0] ss:$8 sps:$4 sm:$0xff]   ;;  %v1684_v6 = vld [vmem:[%s2063_s13 + $0x94] ss:$8 sps:$4 sm:$0xff]  }
 0x19c   : > { %895 = vmatprep.subr.bf16.mxu0 %v1654_v33  ;;  %1133 = vmatpush1.bf16.msra.mxu1 %v1706_v51  ;;  %v1729_v7 = vld [vmem:[%s2075_s27] ss:$8 sps:$4 sm:$0xff]   ;;  %v1730_v8 = vld [vmem:[%s2075_s27 + $0xf4] ss:$8 sps:$4 sm:$0xff]   ;;  %v1686_v9 = vld [vmem:[%s2063_s13 + $0x90] ss:$8 sps:$4 sm:$0xff]  }
 0x19d   : > { %1134 = vmatprep.subr.bf16.mxu1 %v1708_v53  ;;  %v1687_v10 = vld [vmem:[%s2063_s13 + $0x84] ss:$8 sps:$4 sm:$0xff]   ;;  %v1732_v11 = vld [vmem:[%s2075_s27 + $0xf0] ss:$8 sps:$4 sm:$0xff]   ;;  %v1689_v13 = vld [vmem:[%s2063_s13 + $0x80] ss:$8 sps:$4 sm:$0xff]  }
 0x19e   : > { %v1733_v12 = vld [vmem:[%s2075_s27 + $0xe4] ss:$8 sps:$4 sm:$0xff]   ;;  %v1690_v15 = vld [vmem:[%s2065_s29 + $0x78] sm:$0xff]   ;;  %v1175_v16 = vld [vmem:[#allocation3] sm:$0xff]  ;;  %s1547_s13 = sshll.u32 %s1928_s17, 7 }
 0x19f   : > { %896 = vmatpush1.bf16.msra.mxu0 %v1656_v34  ;;  %v691_v14 = vld [vmem:[#allocation2] sm:$0xff]  ;;  %v1736_v19 = vld [vmem:[%s2075_s27 + $0xd4] ss:$8 sps:$4 sm:$0xff]   ;;  %v1177_v21 = vpack.c.bf16 %v1175_v16, %v1175_v16  ;;  %v1738_v23 = vld [vmem:[%s2075_s27 + $0xd0] ss:$8 sps:$4 sm:$0xff]  }
 0x1a0   : > { %897 = vmatprep.subr.bf16.mxu0 %v1657_v35  ;;  %1135 = vmatpush1.bf16.msra.mxu1 %v1711_v55  ;;  %v1735_v17 = vld [vmem:[%s2075_s27 + $0xe0] ss:$8 sps:$4 sm:$0xff]   ;;  %v693_v18 = vpack.c.bf16 %v691_v14, %v691_v14  ;;  %v1691_v20 = vld [vmem:[%s2065_s29 + $0x38] sm:$0xff]   ;;  %v1692_v22 = vld [vmem:[%s2065_s29 + $0x70] sm:$0xff]  }
 0x1a1   : > { %1136 = vmatprep.subr.bf16.mxu1 %v1713_v57  ;;  %v1739_v24 = vld [vmem:[%s2075_s27 + $0xc4] ss:$8 sps:$4 sm:$0xff]   ;;  %v1695_v25 = vld [vmem:[%s2065_s29 + $0x30] sm:$0xff]   ;;  %v1741_v27 = vld [vmem:[%s2075_s27 + $0xc0] ss:$8 sps:$4 sm:$0xff]  }
 0x1a2   : > { %v1697_v26 = vld [vmem:[%s2065_s29 + $0x68] sm:$0xff]   ;;  %v1742_v28 = vld [vmem:[%s2075_s27 + $0xb4] ss:$8 sps:$4 sm:$0xff]   ;;  %v1702_v30 = vld [vmem:[%s2065_s29 + $0x60] sm:$0xff]  }
 0x1a3   : > { %898 = vmatpush1.bf16.msra.mxu0 %v1659_v36  ;;  %v1700_v29 = vld [vmem:[%s2065_s29 + $0x28] sm:$0xff]   ;;  %v1744_v31 = vld [vmem:[%s2075_s27 + $0xb0] ss:$8 sps:$4 sm:$0xff]   ;;  %v1705_v33 = vld [vmem:[%s2065_s29 + $0x20] sm:$0xff]  }
 0x1a4   : > { %899 = vmatprep.subr.bf16.mxu0 %v1660_v37  ;;  %1137 = vmatpush1.bf16.msra.mxu1 %v1716_v59  ;;  %v1745_v32 = vld [vmem:[%s2075_s27 + $0xa4] ss:$8 sps:$4 sm:$0xff]   ;;  %v1707_v34 = vld [vmem:[%s2065_s29 + $0x58] sm:$0xff]   ;;  %v1747_v35 = vld [vmem:[%s2075_s27 + $0xa0] ss:$8 sps:$4 sm:$0xff]  }
 0x1a5   : > { %1138 = vmatprep.subr.bf16.mxu1 %v1718_v60  ;;  %v1710_v36 = vld [vmem:[%s2065_s29 + $0x18] sm:$0xff]   ;;  %v1712_v37 = vld [vmem:[%s2065_s29 + $0x50] sm:$0xff]   ;;  %v1717_v39 = vld [vmem:[%s2065_s29 + $0x48] sm:$0xff]  }
 0x1a6   : > { %v1715_v38 = vld [vmem:[%s2065_s29 + $0x10] sm:$0xff]   ;;  %v1725_v42 = vld [vmem:[%s2065_s29] sm:$0xff]  }
 0x1a7   : > { %900 = vmatpush1.bf16.msra.mxu0 %v1662_v40  ;;  %v1720_v40 = vld [vmem:[%s2065_s29 + $0x8] sm:$0xff]   ;;  %v1750_v46 = vld [vmem:[%s2075_s27 + $0x90] ss:$8 sps:$4 sm:$0xff]  }
 0x1a8   : > { %901 = vmatprep.subr.bf16.mxu0 %v1663_v41  ;;  %1139 = vmatpush1.bf16.msra.mxu1 %v1721_v63  ;;  %v1722_v41 = vld [vmem:[%s2065_s29 + $0x40] sm:$0xff]   ;;  %s1352_s29 = sshra.s32 %s1547_s13, 7 }
 0x1a9   : > { %1140 = vmatprep.subr.bf16.mxu1 %v1723_v0  ;;  %v1753_v48 = vld [vmem:[%s2075_s27 + $0x80] ss:$8 sps:$4 sm:$0xff]  }
 0x1ab   : > { %902 = vmatpush1.bf16.msra.mxu0 %v1665_v43  ;;  %v1174_v43 = vld [vmem:[#allocation3 + $0x8] sm:$0xff] }
 0x1ac   : > { %903 = vmatprep.subr.bf16.mxu0 %v1666_v45  ;;  %1141 = vmatpush1.bf16.msra.mxu1 %v1726_v3  ;;  %v1176_v44 = vpack.c.bf16 %v1174_v43, %v1174_v43  ;;  %v1748_v45 = vld [vmem:[%s2075_s27 + $0x94] ss:$8 sps:$4 sm:$0xff]  }
 0x1ad   : > { %1142 = vmatprep.subr.bf16.mxu1 %v1727_v4  ;;  %v932_v4 = vld [vmem:[#allocation5 + $0x8] sm:$0xff] }
 0x1af   : > { %904 = vmatpush2.bf16.msra.mxu0 %v1668_v47  ;;  %v1751_v47 = vld [vmem:[%s2075_s27 + $0x84] ss:$8 sps:$4 sm:$0xff]   ;;  %s1565_s27 = sshll.u32 %s1352_s29, 3 }
 0x1b0   : > { %905 = vmatprep.subr.bf16.mxu0 %v1669_v49  ;;  %1143 = vmatpush1.bf16.msra.mxu1 %v1729_v7  ;;  %s1355_s22 = scalar_lea.vmem [#allocation4], %s1565_s27 }
 0x1b1   : > { %1144 = vmatprep.subr.bf16.mxu1 %v1730_v8 }
 0x1b3   : > { %906 = vmatpush2.bf16.msra.mxu0 %v1671_v52 }
 0x1b4   : > { %907 = vmatprep.subr.bf16.mxu0 %v1672_v54  ;;  %1145 = vmatpush2.bf16.msra.mxu1 %v1732_v11 }
 0x1b5   : > { %1146 = vmatprep.subr.bf16.mxu1 %v1733_v12 }
 0x1b7   : > { %908 = vmatpush2.bf16.msra.mxu0 %v1674_v56 }
 0x1b8   : > { %909 = vmatprep.subr.bf16.mxu0 %v1675_v58  ;;  %1147 = vmatpush2.bf16.msra.mxu1 %v1735_v17 }
 0x1b9   : > { %1148 = vmatprep.subr.bf16.mxu1 %v1736_v19 }
 0x1bb   : > { %910 = vmatpush2.bf16.msra.mxu0 %v1677_v61 }
 0x1bc   : > { %911 = vmatprep.subr.bf16.mxu0 %v1678_v62  ;;  %1149 = vmatpush2.bf16.msra.mxu1 %v1738_v23 }
 0x1bd   : > { %1150 = vmatprep.subr.bf16.mxu1 %v1739_v24 }
 0x1bf   : > { %912 = vmatpush2.bf16.msra.mxu0 %v1680_v1 }
 0x1c0   : > { %913 = vmatprep.subr.bf16.mxu0 %v1681_v2  ;;  %1151 = vmatpush2.bf16.msra.mxu1 %v1741_v27 }
 0x1c1   : > { %1152 = vmatprep.subr.bf16.mxu1 %v1742_v28 }
 0x1c3   : > { %914 = vmatpush2.bf16.msra.mxu0 %v1683_v5 }
 0x1c4   : > { %915 = vmatprep.subr.bf16.mxu0 %v1684_v6  ;;  %1153 = vmatpush2.bf16.msra.mxu1 %v1744_v31  ;;  %v933_v6 = vld [vmem:[#allocation5] sm:$0xff] }
 0x1c5   : > { %1154 = vmatprep.subr.bf16.mxu1 %v1745_v32 }
 0x1c7   : > { %916 = vmatpush2.bf16.msra.mxu0 %v1686_v9 }
 0x1c8   : > { %917 = vmatprep.subr.bf16.mxu0 %v1687_v10  ;;  %1155 = vmatpush2.bf16.msra.mxu1 %v1747_v35 }
 0x1c9   : > { %1156 = vmatprep.subr.bf16.mxu1 %v1748_v45 }
 0x1cb   : > { %918 = vmatpush2.bf16.msra.mxu0 %v1689_v13 }
 0x1cc   : > { %1573 = vmatprep.subr.bf16.mxu0 %v1690_v15  ;;  %1157 = vmatpush2.bf16.msra.mxu1 %v1750_v46 }
 0x1cd   : > { %1158 = vmatprep.subr.bf16.mxu1 %v1751_v47 }
 0x1ce   : > { %920 = vmatmul.mubr.bf16.vlgmr.msra.gmra.mxu0 %v693_v18 }
 0x1cf   : > { %1574 = vmatpush3.bf16.msra.mxu0 %v1691_v20  ;;  %1338 = vmatprep.mubr.bf16.mxu0 %v1177_v21 }
 0x1d0   : > { %1575 = vmatprep.subr.bf16.mxu0 %v1692_v22  ;;  %1159 = vmatpush2.bf16.msra.mxu1 %v1753_v48 }
 0x1d3   : > { %1576 = vmatpush3.bf16.msra.mxu0 %v1695_v25 }
 0x1d4   : > { %1577 = vmatprep.subr.bf16.mxu0 %v1697_v26 }
 0x1d7   : > { %1578 = vmatpush3.bf16.msra.mxu0 %v1700_v29 }
 0x1d8   : > { %1579 = vmatprep.subr.bf16.mxu0 %v1702_v30 }
 0x1db   : > { %1580 = vmatpush3.bf16.msra.mxu0 %v1705_v33 }
 0x1dc   : > { %1581 = vmatprep.subr.bf16.mxu0 %v1707_v34 }
 0x1df   : > { %1582 = vmatpush3.bf16.msra.mxu0 %v1710_v36 }
 0x1e0   : > { %1583 = vmatprep.subr.bf16.mxu0 %v1712_v37 }
 0x1e3   : > { %1584 = vmatpush3.bf16.msra.mxu0 %v1715_v38 }
 0x1e4   : > { %1585 = vmatprep.subr.bf16.mxu0 %v1717_v39 }
 0x1e7   : > { %1586 = vmatpush3.bf16.msra.mxu0 %v1720_v40 }
 0x1e8   : > { %1587 = vmatprep.subr.bf16.mxu0 %v1722_v41 }
 0x1eb   : > { %1588 = vmatpush3.bf16.msra.mxu0 %v1725_v42 }
 0x1ee   : > { %1339 = vmatmul.mubr.bf16.vlgmr.msra.gmra.mxu0 %v1176_v44 }
 0x28e   : > { %v921_v49 = vpop.f32.mrf.mxu0 }
 0x28f   : > { %v928_v50 = vmax.f32 %v921_v49, 0.0 }
 0x290   : > { %v923_v51 = vpop.f32.mrf.mxu0 }
 0x291   : > { %v929_v52 = vmax.f32 %v923_v51, 0.0  ;;  %v930_v53 = vmul.f32 %v928_v50, %v928_v50 }
 0x292   : > { %v925_v54 = vpop.f32.mrf.mxu0 }
 0x293   : > { %v931_v55 = vmul.f32 %v929_v52, %v929_v52  ;;  %v934_v58 = vpack.c.bf16 %v930_v53, %v930_v53 }
 0x294   : > { %v926_v56 = vpop.f32.mrf.mxu0 }
 0x295   : > { %v935_v57 = vpack.c.bf16 %v931_v55, %v931_v55 }
 0x297   : > { %1160 = vmatprep.mubr.bf16.mxu1 %v935_v57 }
 0x298   : > { %1161 = vmatmul.mubr.bf16.vlgmr.msra.gmra.mxu1 %v934_v58 }
 0x2ae   : > { %v1589_v59 = vpop.f32.mrf.mxu0 }
 0x2b0   : > { %v1590_v60 = vpop.f32.mrf.mxu0 }
 0x2b1   : > { %v1591_v61 = vadd.f32 %v1590_v60, %v1589_v59 }
 0x2b2   : > { %v1592_v62 = vpop.f32.mrf.mxu0 }
 0x2b3   : > { %v1564_v63 = vmul.f32 -1.442695, %v1591_v61 }
 0x2b4   : > { %v1593_v0 = vpop.f32.mrf.mxu0 }
 0x2b5   : > { %1754 = vpow2.f32 %v1564_v63 }
 0x2c2   : > { %v1755_v1 = vpop.eup %1754 }
 0x2c3   : > { %v1349_v2 = vadd.f32 1.0, %v1755_v1 }
 0x2c5   : > { %1756 = vrcp.f32 %v1349_v2 }
 0x2d2   : > { %v1757_v3 = vpop.eup %1756 }
 0x2d3   : > { %1356 = vst [vmem:[%s1355_s22] sm:$0xff] %v1757_v3 }
 0x358   : > { %v1162_v5 = vpop.f32.mrf.mxu1 }
 0x359   : > { %v1169_v7 = vadd.f32 %v1162_v5, %v932_v4 }
 0x35a   : > { %v1164_v8 = vpop.f32.mrf.mxu1  ;;  %1360 = sbr.rel (%p1566_p6) target bundleno = 874 (0x36a), region = 106 }
 0x35b   : > { %1171 = vst [vmem:[#allocation5 + $0x8] sm:$0xff] %v1169_v7  ;;  %v1170_v9 = vadd.f32 %v1164_v8, %v933_v6 }
 0x35c   : > { %v1166_v10 = vpop.f32.mrf.mxu1 }
 0x35d   : > { %1172 = vst [vmem:[#allocation5] sm:$0xff] %v1170_v9 }
 0x35e   : > { %v1167_v11 = vpop.f32.mrf.mxu1 }
 0x35f   : > { %v1361_v12 = vld [vmem:[%s2221_s0] sm:$0xff]  ;;  %v1362_v16 = vld [vmem:[%s2221_s0 + $0x8] sm:$0xff] }
 0x360   : > { %v1363_v13 = vld [vmem:[#allocation4] sm:$0xff]  ;;  %v1364_v17 = vld [vmem:[#allocation4 + $0x8] sm:$0xff] }
 0x362   : > { %v1365_v14 = vld [vmem:[#allocation5 + $0x8] sm:$0xff] }
 0x363   : > { %v1367_v15 = vmul.f32 %v1365_v14, %v1363_v13 }
 0x364   : > { %v1366_v18 = vld [vmem:[#allocation5] sm:$0xff] }
 0x365   : > { %v1368_v19 = vmul.f32 %v1366_v18, %v1364_v17  ;;  %v1369_v20 = vadd.f32 %v1367_v15, %v1361_v12 }
 0x367   : > { %v1370_v21 = vadd.f32 %v1368_v19, %v1362_v16  ;;  %1371 = vst [vmem:[#allocation10] sm:$0xff] %v1369_v20 }
 0x369   : > { %1372 = vst [vmem:[#allocation10 + $0x8] sm:$0xff] %v1370_v21 }
 0x36a PF: > { %p1601_p0 = scmp.eq.s32.totalorder %s1928_s17, 1  ;;  %s1853_s30 = smov [#allocation10]  }
 0x36b   : > { %s1380_s19 = sshll.u32 %s1853_s30, 4  ;;  %s1381_s19 = int_to_ptr.vmem [resolvable:$true] %s1380_s19 }
 0x36c   : > { %s1784_s23 = scalar_lea.vmem %s1381_s19, 256  ;;  %p1791_p5 = scmp.lt.s32.totalorder %s1381_s19, %s1381_s19 }
 0x36d   : > { %p1785_p1 = scmp.ne.s32.totalorder %s1381_s19, %s1784_s23  ;;  %p1792_p7 = scmp.lt.s32.totalorder %s1784_s23, %s1784_s23 }
 0x36f   : > { %p1786_p2 = pnand %p1785_p1, %p1601_p0  ;;  %p1793_p8 = por %p1792_p7, %p1791_p5 }
 0x371   : > { %p1787_p3 = pneg %p1786_p2 }
 0x373   : > { %p1794_p9 = pnand %p1793_p8, %p1787_p3 }
 0x375   : > { %1797 = shalt.err (!%p1794_p9)
}
 0x376   : > { %1598 = dma.vmem_to_hbm [thread:$0]  (%p1601_p0), %s1381_s19, 256, %s2230_s9, [#allocation9]  }
 0x377   : > { %1829 = dma.done.wait (%p1601_p0), [#allocation9], 256  }
 0x378   : > { %1831 = vsyncadd (%p1601_p0), [#allocation9], 4294967040 }
 0x379 PF: > { %p22_p10 = scmp.ge.s32.totalorder %s1931_s18, 4   ;;  %s2234_s13 = smov %s1838_s14 }
 0x37a   : > { %s2235_s14 = smov %s1842_s15  ;;  %s2236_s15 = smov %s1941_s21 }
 0x37b   : > { %s2237_s16 = smov %s1931_s18  ;;  %24 = sbr.rel (!%p22_p10) target bundleno = 4 (0x4), region = 159 }
 0x380   :  { %1399 = vsyncpa [#allocation8], 1 }
 0x381   :  { %1401 = vsyncpa [#allocation8 + $0x1], 1 }
 0x382   :  { %1402 = vsyncpa [#allocation9], 1 }
 0x383   :  { %1404 = vsyncpa [#allocation9 + $0x1], 1 }

</bundles_post_ra>
